<compile_context>
chip_gen: v7x
topology: tpu7x:2x2x1
jax: 0.10.0
libtpu: 0.0.40
codegen_flags: <defaults>
</compile_context>

<pallas_src>
import jax
import jax.numpy as jnp
from jax import lax
from jax.experimental import pallas as pl
from jax.experimental.pallas import tpu as pltpu

# ----------------------- config (module hyperparameters) ---------------------
B = 2            # batch
HID = 32         # hidden_channels
KS = 3           # kernel_size (odd)
DIL = 2          # dilation_rate
NL = 3           # n_layers
T = 128          # time length (lane-tile multiple -> lane-dense packing)
LANES = B * T    # batch packed into lanes inside the kernel


# ----------------------- Pallas kernel ---------------------------------------
def _wn_kernel(x_ref, iw_ref, ib_ref, rw_ref, rb_ref, rwl_ref, rbl_ref, o_ref):
    f32 = jnp.float32
    bf16 = jnp.bfloat16

    # Pack batch into lanes: (B, HID, T) -> (HID, B*T).  T is a multiple of
    # 128, so this concat is lane-tile-aligned placement (no host transpose).
    x = jnp.concatenate([x_ref[b] for b in range(B)], axis=1).astype(f32)
    out = jnp.zeros((HID, LANES), f32)

    # Hoisted boundary masks: one compare per distinct nonzero tap offset.
    # They emulate the zero 'same' padding at the edges of each length-T
    # segment (and also kill any roll wrap-around / cross-segment leakage).
    tmod = lax.broadcasted_iota(jnp.int32, (HID, LANES), 1) % T
    offsets = set()
    for i in range(NL):
        d = DIL ** i
        pad = (KS * d - d) // 2
        for k in range(KS):
            off = k * d - pad
            if off != 0:
                offsets.add(off)
    keep = {off: (tmod < (T - off)) if off > 0 else (tmod >= -off)
            for off in sorted(offsets)}

    def tap(v, off):
        # tap[:, b*T + t] = v[:, b*T + t + off] if 0 <= t+off < T else 0
        if off == 0:
            return v
        rolled = pltpu.roll(v, shift=(-off) % LANES, axis=1)   # XLU rotate
        return jnp.where(keep[off], rolled, 0.0)               # VPU select

    for i in range(NL):                                        # static unroll
        d = DIL ** i
        pad = (KS * d - d) // 2
        # KS shifted copies stacked on sublanes -> single fused-tap matmul of
        # shape (2*HID, KS*HID) @ (KS*HID, B*T) with bf16 inputs, f32 accum.
        xs = jnp.concatenate([tap(x, k * d - pad) for k in range(KS)], axis=0)
        y = jnp.dot(iw_ref[i], xs.astype(bf16),
                    preferred_element_type=f32) + ib_ref[i]

        # fused_add_tanh_sigmoid_multiply with g = 0; dropout p=0 is identity
        acts = jnp.tanh(y[:HID, :]) * jax.nn.sigmoid(y[HID:, :])   # f32 EUP
        a16 = acts.astype(bf16)

        if i < NL - 1:
            rs = jnp.dot(rw_ref[i], a16,
                         preferred_element_type=f32) + rb_ref[i]
            x = x + rs[:HID, :]          # residual
            out = out + rs[HID:, :]      # skip
        else:
            # last layer: dedicated (HID, HID) res/skip weight (skip only)
            rs = jnp.dot(rwl_ref[...], a16,
                         preferred_element_type=f32) + rbl_ref[...]
            out = out + rs

    # Unpack lanes back to (B, HID, T): lane-tile-aligned slices per batch.
    for b in range(B):
        o_ref[b] = out[:, b * T:(b + 1) * T].astype(o_ref.dtype)
    # TODO(synk): optional conditioning input `g` (gin_channels > 0) and
    # dropout with p_dropout > 0 are not implemented; this covers the default
    # forward path (g=None, p_dropout=0).


@jax.jit
def wn_forward(x, iw, ib, rw, rb, rwl, rbl):
    args = (x, iw, ib, rw, rb, rwl, rbl)

    def full_spec(a):
        nd = a.ndim
        return pl.BlockSpec(a.shape, lambda nd=nd: (0,) * nd)

    return pl.pallas_call(
        _wn_kernel,
        out_shape=jax.ShapeDtypeStruct((B, HID, T), jnp.float32),
        grid=(),
        in_specs=[full_spec(a) for a in args],
        out_specs=pl.BlockSpec((B, HID, T), lambda: (0, 0, 0)),
    )(*args)


# ----------------------- deterministic parameter init ------------------------
def init_params(key):
    # weight_norm is a reparameterization; at inference it folds into the
    # effective conv weights, which is what we initialize here.
    ks = jax.random.split(key, 6)
    scale = 0.1

    def rnd(k, shape):
        return scale * jax.random.normal(k, shape, jnp.float32)

    return dict(
        in_w=rnd(ks[0], (NL, 2 * HID, HID, KS)),   # torch Conv1d (Co, Ci, K)
        in_b=rnd(ks[1], (NL, 2 * HID)),
        rs_w=rnd(ks[2], (NL - 1, 2 * HID, HID)),   # layers 0 .. NL-2
        rs_b=rnd(ks[3], (NL - 1, 2 * HID)),
        rs_w_last=rnd(ks[4], (HID, HID)),          # last layer: HID outputs
        rs_b_last=rnd(ks[5], (HID,)),
    )


def kernel_args(P):
    bf16 = jnp.bfloat16
    # Fuse the KS taps: (NL, Co, Ci, K) -> (NL, Co, K*Ci) so that column
    # k*HID + c multiplies xs row k*HID + c (= x[c] shifted by k*d - pad).
    iw = jnp.transpose(P['in_w'], (0, 1, 3, 2)).reshape(
        NL, 2 * HID, KS * HID).astype(bf16)
    ib = P['in_b'][:, :, None].astype(jnp.float32)
    rw = P['rs_w'].astype(bf16)                       # (NL-1, 2H, H)
    rb = P['rs_b'][:, :, None].astype(jnp.float32)    # (NL-1, 2H, 1)
    rwl = P['rs_w_last'].astype(bf16)                 # (H, H)
    rbl = P['rs_b_last'][:, None].astype(jnp.float32) # (H, 1)
    return iw, ib, rw, rb, rwl, rbl


# ----------------------- pure-JAX reference (mirrors the PyTorch code) -------
# Matmul inputs are cast to bf16 with f32 accumulation to match the kernel's
# MXU numerics; everything else (bias, gating, residual/skip) is f32.
def reference_forward(x, P):
    bf16, f32 = jnp.bfloat16, jnp.float32
    out = jnp.zeros_like(x)
    for i in range(NL):
        d = DIL ** i
        pad = (KS * d - d) // 2
        xp = jnp.pad(x, ((0, 0), (0, 0), (pad, pad)))
        y = P['in_b'][i][None, :, None].astype(f32)
        for k in range(KS):
            y = y + jnp.einsum('oc,bct->bot',
                               P['in_w'][i, :, :, k].astype(bf16),
                               xp[:, :, k * d:k * d + T].astype(bf16),
                               preferred_element_type=f32)
        acts = jnp.tanh(y[:, :HID]) * jax.nn.sigmoid(y[:, HID:])
        if i < NL - 1:
            rs = jnp.einsum('oc,bct->bot', P['rs_w'][i].astype(bf16),
                            acts.astype(bf16), preferred_element_type=f32) \
                 + P['rs_b'][i][None, :, None]
            x = x + rs[:, :HID]
            out = out + rs[:, HID:]
        else:
            rs = jnp.einsum('oc,bct->bot', P['rs_w_last'].astype(bf16),
                            acts.astype(bf16), preferred_element_type=f32) \
                 + P['rs_b_last'][None, :, None]
            out = out + rs
    return out


# ----------------------- main -------------------------------------------------
if __name__ == "__main__":
    key = jax.random.PRNGKey(0)
    kp, kx = jax.random.split(key)
    P = init_params(kp)
    x = jax.random.normal(kx, (B, HID, T), jnp.float32)

    y = wn_forward(x, *kernel_args(P))
    y = jax.block_until_ready(y)

    y_ref = reference_forward(x, P)
    err = float(jnp.max(jnp.abs(y - y_ref)))
    assert err < 5e-3, f"mismatch vs reference: max abs err = {err}"
    print("KERNEL_OK")
</pallas_src>

<mosaic_0001>
module attributes {stable_mosaic.version = 11 : i64} {
  func.func @_wn_kernel(%arg0: memref<2x32x128xf32, #tpu.memory_space<vmem>>, %arg1: memref<3x64x96xbf16, #tpu.memory_space<vmem>>, %arg2: memref<3x64x1xf32, #tpu.memory_space<vmem>>, %arg3: memref<2x64x32xbf16, #tpu.memory_space<vmem>>, %arg4: memref<2x64x1xf32, #tpu.memory_space<vmem>>, %arg5: memref<32x32xbf16, #tpu.memory_space<vmem>>, %arg6: memref<32x1xf32, #tpu.memory_space<vmem>>, %arg7: memref<2x32x128xf32, #tpu.memory_space<vmem>>) attributes {dimension_semantics = [], scalar_prefetch = 0 : i64, scratch_operands = 0 : i64, tpu.core_type = #tpu.core_type<tc>} {
    %c0 = arith.constant 0 : index
    %c0_0 = arith.constant 0 : index
    %c0_1 = arith.constant 0 : index
    %0 = vector.load %arg0[%c0, %c0_0, %c0_1] : memref<2x32x128xf32, #tpu.memory_space<vmem>>, vector<1x32x128xf32>
    %1 = vector.shape_cast %0 : vector<1x32x128xf32> to vector<32x128xf32>
    %c1 = arith.constant 1 : index
    %c0_2 = arith.constant 0 : index
    %c0_3 = arith.constant 0 : index
    %2 = vector.load %arg0[%c1, %c0_2, %c0_3] : memref<2x32x128xf32, #tpu.memory_space<vmem>>, vector<1x32x128xf32>
    %3 = vector.shape_cast %2 : vector<1x32x128xf32> to vector<32x128xf32>
    %4 = tpu.concatenate %1, %3 in 1 : vector<32x128xf32>, vector<32x128xf32> -> vector<32x256xf32>
    %cst = arith.constant 0.000000e+00 : f32
    %5 = vector.broadcast %cst : f32 to vector<32x256xf32>
    %6 = tpu.iota {dimensions = array<i32: 1>} : vector<32x256xi32>
    %c128_i32 = arith.constant 128 : i32
    %c0_i32 = arith.constant 0 : i32
    %7 = arith.cmpi eq, %c128_i32, %c0_i32 : i32
    %c1_i32 = arith.constant 1 : i32
    %8 = arith.select %7, %c1_i32, %c128_i32 : i32
    %9 = vector.broadcast %8 : i32 to vector<32x256xi32>
    %10 = arith.remsi %6, %9 : vector<32x256xi32>
    %c0_i32_4 = arith.constant 0 : i32
    %11 = vector.broadcast %c0_i32_4 : i32 to vector<32x256xi32>
    %12 = arith.cmpi ne, %10, %11 : vector<32x256xi32>
    %c0_i32_5 = arith.constant 0 : i32
    %13 = vector.broadcast %c0_i32_5 : i32 to vector<32x256xi32>
    %14 = arith.cmpi slt, %10, %13 : vector<32x256xi32>
    %c0_i32_6 = arith.constant 0 : i32
    %15 = arith.cmpi slt, %8, %c0_i32_6 : i32
    %16 = vector.broadcast %15 : i1 to vector<32x256xi1>
    %17 = vector.broadcast %16 : vector<32x256xi1> to vector<32x256xi1>
    %18 = arith.xori %14, %17 : vector<32x256xi1>
    %19 = arith.andi %18, %12 : vector<32x256xi1>
    %20 = vector.broadcast %8 : i32 to vector<32x256xi32>
    %21 = arith.addi %10, %20 : vector<32x256xi32>
    %22 = arith.select %19, %21, %10 : vector<32x256xi1>, vector<32x256xi32>
    %c4_i32 = arith.constant 4 : i32
    %23 = vector.broadcast %c4_i32 : i32 to vector<32x256xi32>
    %24 = arith.cmpi sge, %22, %23 : vector<32x256xi32>
    %c2_i32 = arith.constant 2 : i32
    %25 = vector.broadcast %c2_i32 : i32 to vector<32x256xi32>
    %26 = arith.cmpi sge, %22, %25 : vector<32x256xi32>
    %c1_i32_7 = arith.constant 1 : i32
    %27 = vector.broadcast %c1_i32_7 : i32 to vector<32x256xi32>
    %28 = arith.cmpi sge, %22, %27 : vector<32x256xi32>
    %c127_i32 = arith.constant 127 : i32
    %29 = vector.broadcast %c127_i32 : i32 to vector<32x256xi32>
    %30 = arith.cmpi slt, %22, %29 : vector<32x256xi32>
    %c126_i32 = arith.constant 126 : i32
    %31 = vector.broadcast %c126_i32 : i32 to vector<32x256xi32>
    %32 = arith.cmpi slt, %22, %31 : vector<32x256xi32>
    %c124_i32 = arith.constant 124 : i32
    %33 = vector.broadcast %c124_i32 : i32 to vector<32x256xi32>
    %34 = arith.cmpi slt, %22, %33 : vector<32x256xi32>
    %c1_i32_8 = arith.constant 1 : i32
    %35 = tpu.dynamic_rotate %4 by %c1_i32_8 dim 1 : vector<32x256xf32>, i32 -> vector<32x256xf32>
    %cst_9 = arith.constant 0.000000e+00 : f32
    %36 = vector.broadcast %cst_9 : f32 to vector<32x256xf32>
    %37 = arith.select %28, %35, %36 : vector<32x256xi1>, vector<32x256xf32>
    %c255_i32 = arith.constant 255 : i32
    %38 = tpu.dynamic_rotate %4 by %c255_i32 dim 1 : vector<32x256xf32>, i32 -> vector<32x256xf32>
    %cst_10 = arith.constant 0.000000e+00 : f32
    %39 = vector.broadcast %cst_10 : f32 to vector<32x256xf32>
    %40 = arith.select %30, %38, %39 : vector<32x256xi1>, vector<32x256xf32>
    %41 = tpu.concatenate %37, %4, %40 in 0 : vector<32x256xf32>, vector<32x256xf32>, vector<32x256xf32> -> vector<96x256xf32>
    %c0_11 = arith.constant 0 : index
    %c0_12 = arith.constant 0 : index
    %c0_13 = arith.constant 0 : index
    %42 = vector.load %arg1[%c0_11, %c0_12, %c0_13] : memref<3x64x96xbf16, #tpu.memory_space<vmem>>, vector<1x64x96xbf16>
    %43 = vector.shape_cast %42 : vector<1x64x96xbf16> to vector<64x96xbf16>
    %44 = arith.truncf %41 : vector<96x256xf32> to vector<96x256xbf16>
    %cst_14 = arith.constant dense<0.000000e+00> : vector<64x256xf32>
    %45 = tpu.matmul %43, %44, %cst_14 {dimension_numbers = #tpu.dot_dimension_numbers<[1], [0], [0], [1], [0, 0, 1, 1], [], []>} : vector<64x96xbf16>, vector<96x256xbf16>, vector<64x256xf32> -> vector<64x256xf32>
    %c0_15 = arith.constant 0 : index
    %c0_16 = arith.constant 0 : index
    %c0_17 = arith.constant 0 : index
    %46 = vector.load %arg2[%c0_15, %c0_16, %c0_17] : memref<3x64x1xf32, #tpu.memory_space<vmem>>, vector<1x64x1xf32>
    %47 = vector.shape_cast %46 : vector<1x64x1xf32> to vector<64x1xf32>
    %48 = vector.broadcast %47 : vector<64x1xf32> to vector<64x256xf32>
    %49 = arith.addf %45, %48 : vector<64x256xf32>
    %50 = vector.extract_strided_slice %49 {offsets = [0, 0], sizes = [32, 256], strides = [1, 1]} : vector<64x256xf32> to vector<32x256xf32>
    %51 = math.tanh %50 : vector<32x256xf32>
    %52 = vector.extract_strided_slice %49 {offsets = [32, 0], sizes = [32, 256], strides = [1, 1]} : vector<64x256xf32> to vector<32x256xf32>
    %53 = arith.negf %52 : vector<32x256xf32>
    %54 = math.exp %53 : vector<32x256xf32>
    %cst_18 = arith.constant 1.000000e+00 : f32
    %55 = vector.broadcast %cst_18 : f32 to vector<32x256xf32>
    %56 = arith.addf %55, %54 : vector<32x256xf32>
    %57 = arith.divf %55, %56 : vector<32x256xf32>
    %58 = arith.mulf %51, %57 : vector<32x256xf32>
    %59 = arith.truncf %58 : vector<32x256xf32> to vector<32x256xbf16>
    %c0_19 = arith.constant 0 : index
    %c0_20 = arith.constant 0 : index
    %c0_21 = arith.constant 0 : index
    %60 = vector.load %arg3[%c0_19, %c0_20, %c0_21] : memref<2x64x32xbf16, #tpu.memory_space<vmem>>, vector<1x64x32xbf16>
    %61 = vector.shape_cast %60 : vector<1x64x32xbf16> to vector<64x32xbf16>
    %cst_22 = arith.constant dense<0.000000e+00> : vector<64x256xf32>
    %62 = tpu.matmul %61, %59, %cst_22 {dimension_numbers = #tpu.dot_dimension_numbers<[1], [0], [0], [1], [0, 0, 1, 1], [], []>} : vector<64x32xbf16>, vector<32x256xbf16>, vector<64x256xf32> -> vector<64x256xf32>
    %c0_23 = arith.constant 0 : index
    %c0_24 = arith.constant 0 : index
    %c0_25 = arith.constant 0 : index
    %63 = vector.load %arg4[%c0_23, %c0_24, %c0_25] : memref<2x64x1xf32, #tpu.memory_space<vmem>>, vector<1x64x1xf32>
    %64 = vector.shape_cast %63 : vector<1x64x1xf32> to vector<64x1xf32>
    %65 = vector.broadcast %64 : vector<64x1xf32> to vector<64x256xf32>
    %66 = arith.addf %62, %65 : vector<64x256xf32>
    %67 = vector.extract_strided_slice %66 {offsets = [0, 0], sizes = [32, 256], strides = [1, 1]} : vector<64x256xf32> to vector<32x256xf32>
    %68 = arith.addf %4, %67 : vector<32x256xf32>
    %69 = vector.extract_strided_slice %66 {offsets = [32, 0], sizes = [32, 256], strides = [1, 1]} : vector<64x256xf32> to vector<32x256xf32>
    %70 = arith.addf %5, %69 : vector<32x256xf32>
    %c2_i32_26 = arith.constant 2 : i32
    %71 = tpu.dynamic_rotate %68 by %c2_i32_26 dim 1 : vector<32x256xf32>, i32 -> vector<32x256xf32>
    %cst_27 = arith.constant 0.000000e+00 : f32
    %72 = vector.broadcast %cst_27 : f32 to vector<32x256xf32>
    %73 = arith.select %26, %71, %72 : vector<32x256xi1>, vector<32x256xf32>
    %c254_i32 = arith.constant 254 : i32
    %74 = tpu.dynamic_rotate %68 by %c254_i32 dim 1 : vector<32x256xf32>, i32 -> vector<32x256xf32>
    %cst_28 = arith.constant 0.000000e+00 : f32
    %75 = vector.broadcast %cst_28 : f32 to vector<32x256xf32>
    %76 = arith.select %32, %74, %75 : vector<32x256xi1>, vector<32x256xf32>
    %77 = tpu.concatenate %73, %68, %76 in 0 : vector<32x256xf32>, vector<32x256xf32>, vector<32x256xf32> -> vector<96x256xf32>
    %c1_29 = arith.constant 1 : index
    %c0_30 = arith.constant 0 : index
    %c0_31 = arith.constant 0 : index
    %78 = vector.load %arg1[%c1_29, %c0_30, %c0_31] : memref<3x64x96xbf16, #tpu.memory_space<vmem>>, vector<1x64x96xbf16>
    %79 = vector.shape_cast %78 : vector<1x64x96xbf16> to vector<64x96xbf16>
    %80 = arith.truncf %77 : vector<96x256xf32> to vector<96x256xbf16>
    %cst_32 = arith.constant dense<0.000000e+00> : vector<64x256xf32>
    %81 = tpu.matmul %79, %80, %cst_32 {dimension_numbers = #tpu.dot_dimension_numbers<[1], [0], [0], [1], [0, 0, 1, 1], [], []>} : vector<64x96xbf16>, vector<96x256xbf16>, vector<64x256xf32> -> vector<64x256xf32>
    %c1_33 = arith.constant 1 : index
    %c0_34 = arith.constant 0 : index
    %c0_35 = arith.constant 0 : index
    %82 = vector.load %arg2[%c1_33, %c0_34, %c0_35] : memref<3x64x1xf32, #tpu.memory_space<vmem>>, vector<1x64x1xf32>
    %83 = vector.shape_cast %82 : vector<1x64x1xf32> to vector<64x1xf32>
    %84 = vector.broadcast %83 : vector<64x1xf32> to vector<64x256xf32>
    %85 = arith.addf %81, %84 : vector<64x256xf32>
    %86 = vector.extract_strided_slice %85 {offsets = [0, 0], sizes = [32, 256], strides = [1, 1]} : vector<64x256xf32> to vector<32x256xf32>
    %87 = math.tanh %86 : vector<32x256xf32>
    %88 = vector.extract_strided_slice %85 {offsets = [32, 0], sizes = [32, 256], strides = [1, 1]} : vector<64x256xf32> to vector<32x256xf32>
    %89 = arith.negf %88 : vector<32x256xf32>
    %90 = math.exp %89 : vector<32x256xf32>
    %cst_36 = arith.constant 1.000000e+00 : f32
    %91 = vector.broadcast %cst_36 : f32 to vector<32x256xf32>
    %92 = arith.addf %91, %90 : vector<32x256xf32>
    %93 = arith.divf %91, %92 : vector<32x256xf32>
    %94 = arith.mulf %87, %93 : vector<32x256xf32>
    %95 = arith.truncf %94 : vector<32x256xf32> to vector<32x256xbf16>
    %c1_37 = arith.constant 1 : index
    %c0_38 = arith.constant 0 : index
    %c0_39 = arith.constant 0 : index
    %96 = vector.load %arg3[%c1_37, %c0_38, %c0_39] : memref<2x64x32xbf16, #tpu.memory_space<vmem>>, vector<1x64x32xbf16>
    %97 = vector.shape_cast %96 : vector<1x64x32xbf16> to vector<64x32xbf16>
    %cst_40 = arith.constant dense<0.000000e+00> : vector<64x256xf32>
    %98 = tpu.matmul %97, %95, %cst_40 {dimension_numbers = #tpu.dot_dimension_numbers<[1], [0], [0], [1], [0, 0, 1, 1], [], []>} : vector<64x32xbf16>, vector<32x256xbf16>, vector<64x256xf32> -> vector<64x256xf32>
    %c1_41 = arith.constant 1 : index
    %c0_42 = arith.constant 0 : index
    %c0_43 = arith.constant 0 : index
    %99 = vector.load %arg4[%c1_41, %c0_42, %c0_43] : memref<2x64x1xf32, #tpu.memory_space<vmem>>, vector<1x64x1xf32>
    %100 = vector.shape_cast %99 : vector<1x64x1xf32> to vector<64x1xf32>
    %101 = vector.broadcast %100 : vector<64x1xf32> to vector<64x256xf32>
    %102 = arith.addf %98, %101 : vector<64x256xf32>
    %103 = vector.extract_strided_slice %102 {offsets = [0, 0], sizes = [32, 256], strides = [1, 1]} : vector<64x256xf32> to vector<32x256xf32>
    %104 = arith.addf %68, %103 : vector<32x256xf32>
    %105 = vector.extract_strided_slice %102 {offsets = [32, 0], sizes = [32, 256], strides = [1, 1]} : vector<64x256xf32> to vector<32x256xf32>
    %106 = arith.addf %70, %105 : vector<32x256xf32>
    %c4_i32_44 = arith.constant 4 : i32
    %107 = tpu.dynamic_rotate %104 by %c4_i32_44 dim 1 : vector<32x256xf32>, i32 -> vector<32x256xf32>
    %cst_45 = arith.constant 0.000000e+00 : f32
    %108 = vector.broadcast %cst_45 : f32 to vector<32x256xf32>
    %109 = arith.select %24, %107, %108 : vector<32x256xi1>, vector<32x256xf32>
    %c252_i32 = arith.constant 252 : i32
    %110 = tpu.dynamic_rotate %104 by %c252_i32 dim 1 : vector<32x256xf32>, i32 -> vector<32x256xf32>
    %cst_46 = arith.constant 0.000000e+00 : f32
    %111 = vector.broadcast %cst_46 : f32 to vector<32x256xf32>
    %112 = arith.select %34, %110, %111 : vector<32x256xi1>, vector<32x256xf32>
    %113 = tpu.concatenate %109, %104, %112 in 0 : vector<32x256xf32>, vector<32x256xf32>, vector<32x256xf32> -> vector<96x256xf32>
    %c2 = arith.constant 2 : index
    %c0_47 = arith.constant 0 : index
    %c0_48 = arith.constant 0 : index
    %114 = vector.load %arg1[%c2, %c0_47, %c0_48] : memref<3x64x96xbf16, #tpu.memory_space<vmem>>, vector<1x64x96xbf16>
    %115 = vector.shape_cast %114 : vector<1x64x96xbf16> to vector<64x96xbf16>
    %116 = arith.truncf %113 : vector<96x256xf32> to vector<96x256xbf16>
    %cst_49 = arith.constant dense<0.000000e+00> : vector<64x256xf32>
    %117 = tpu.matmul %115, %116, %cst_49 {dimension_numbers = #tpu.dot_dimension_numbers<[1], [0], [0], [1], [0, 0, 1, 1], [], []>} : vector<64x96xbf16>, vector<96x256xbf16>, vector<64x256xf32> -> vector<64x256xf32>
    %c2_50 = arith.constant 2 : index
    %c0_51 = arith.constant 0 : index
    %c0_52 = arith.constant 0 : index
    %118 = vector.load %arg2[%c2_50, %c0_51, %c0_52] : memref<3x64x1xf32, #tpu.memory_space<vmem>>, vector<1x64x1xf32>
    %119 = vector.shape_cast %118 : vector<1x64x1xf32> to vector<64x1xf32>
    %120 = vector.broadcast %119 : vector<64x1xf32> to vector<64x256xf32>
    %121 = arith.addf %117, %120 : vector<64x256xf32>
    %122 = vector.extract_strided_slice %121 {offsets = [0, 0], sizes = [32, 256], strides = [1, 1]} : vector<64x256xf32> to vector<32x256xf32>
    %123 = math.tanh %122 : vector<32x256xf32>
    %124 = vector.extract_strided_slice %121 {offsets = [32, 0], sizes = [32, 256], strides = [1, 1]} : vector<64x256xf32> to vector<32x256xf32>
    %125 = arith.negf %124 : vector<32x256xf32>
    %126 = math.exp %125 : vector<32x256xf32>
    %cst_53 = arith.constant 1.000000e+00 : f32
    %127 = vector.broadcast %cst_53 : f32 to vector<32x256xf32>
    %128 = arith.addf %127, %126 : vector<32x256xf32>
    %129 = arith.divf %127, %128 : vector<32x256xf32>
    %130 = arith.mulf %123, %129 : vector<32x256xf32>
    %131 = arith.truncf %130 : vector<32x256xf32> to vector<32x256xbf16>
    %c0_54 = arith.constant 0 : index
    %c0_55 = arith.constant 0 : index
    %132 = vector.load %arg5[%c0_54, %c0_55] : memref<32x32xbf16, #tpu.memory_space<vmem>>, vector<32x32xbf16>
    %cst_56 = arith.constant dense<0.000000e+00> : vector<32x256xf32>
    %133 = tpu.matmul %132, %131, %cst_56 {dimension_numbers = #tpu.dot_dimension_numbers<[1], [0], [0], [1], [0, 0, 1, 1], [], []>} : vector<32x32xbf16>, vector<32x256xbf16>, vector<32x256xf32> -> vector<32x256xf32>
    %c0_57 = arith.constant 0 : index
    %c0_58 = arith.constant 0 : index
    %134 = vector.load %arg6[%c0_57, %c0_58] : memref<32x1xf32, #tpu.memory_space<vmem>>, vector<32x1xf32>
    %135 = vector.broadcast %134 : vector<32x1xf32> to vector<32x256xf32>
    %136 = arith.addf %133, %135 : vector<32x256xf32>
    %137 = arith.addf %106, %136 : vector<32x256xf32>
    %138 = vector.extract_strided_slice %137 {offsets = [0, 0], sizes = [32, 128], strides = [1, 1]} : vector<32x256xf32> to vector<32x128xf32>
    %c0_59 = arith.constant 0 : index
    %c0_60 = arith.constant 0 : index
    %c0_61 = arith.constant 0 : index
    %139 = vector.load %arg7[%c0_59, %c0_60, %c0_61] : memref<2x32x128xf32, #tpu.memory_space<vmem>>, vector<1x32x128xf32>
    %140 = vector.shape_cast %139 : vector<1x32x128xf32> to vector<32x128xf32>
    %141 = vector.shape_cast %138 : vector<32x128xf32> to vector<1x32x128xf32>
    tpu.vector_store %arg7[%c0_59, %c0_60, %c0_61], %141 {strides = array<i32>} : memref<2x32x128xf32, #tpu.memory_space<vmem>>, vector<1x32x128xf32>,
    %142 = vector.extract_strided_slice %137 {offsets = [0, 128], sizes = [32, 128], strides = [1, 1]} : vector<32x256xf32> to vector<32x128xf32>
    %c1_62 = arith.constant 1 : index
    %c0_63 = arith.constant 0 : index
    %c0_64 = arith.constant 0 : index
    %143 = vector.load %arg7[%c1_62, %c0_63, %c0_64] : memref<2x32x128xf32, #tpu.memory_space<vmem>>, vector<1x32x128xf32>
    %144 = vector.shape_cast %143 : vector<1x32x128xf32> to vector<32x128xf32>
    %145 = vector.shape_cast %142 : vector<32x128xf32> to vector<1x32x128xf32>
    tpu.vector_store %arg7[%c1_62, %c0_63, %c0_64], %145 {strides = array<i32>} : memref<2x32x128xf32, #tpu.memory_space<vmem>>, vector<1x32x128xf32>,
    return
  }
}

</mosaic_0001>

<bundles_post_ra>
// kernel: wn_forward.1
= control target key start
LH: loop header
LB: loop body
LE: loop exit
PB: predicated region body
PF: predicated region fallthrough
CT: control target
= control target key end

     0   :  { %s2043_s17 = smov 1   ;;  %s2044_s18 = smov 127   ;;  %s2695_s0 = inlined_call_operand.vmem [shape: f32[2,32,128], index: 0, kind: input, shape index: {}]   ;;  %s2696_s1 = inlined_call_operand.vmem [shape: bf16[3,64,96], index: 1, kind: input, shape index: {}]   ;;  %s2697_s2 = inlined_call_operand.vmem [shape: f32[3,64,1], index: 2, kind: input, shape index: {}]   ;;  %s2698_s3 = inlined_call_operand.vmem [shape: bf16[2,64,32], index: 3, kind: input, shape index: {}]   ;;  %s2699_s4 = inlined_call_operand.vmem [shape: f32[2,64,1], index: 4, kind: input, shape index: {}]   ;;  %s2700_s5 = inlined_call_operand.vmem [shape: bf16[32,32], index: 5, kind: input, shape index: {}]   ;;  %s2701_s6 = inlined_call_operand.vmem [shape: f32[32,1], index: 6, kind: input, shape index: {}]   ;;  %s2702_s7 = inlined_call_operand.hbm [shape: f32[2,32,128], index: 7, kind: output, shape index: {}]  }
   0x1   :  { %v2096_v0 = vld [vmem:[%s2695_s0 + $0x10] sm:$0xff]  ;;  %v2101_v1 = vld [vmem:[%s2695_s0 + $0x18] sm:$0xff]  ;;  %v2106_v2 = vld [vmem:[%s2695_s0] sm:$0xff] }
   0x2   :  { %v1741_v3 = vpack.i.bf16 %v2101_v1, %v2096_v0  ;;  %v2113_v4 = vld [vmem:[%s2695_s0 + $0x8] sm:$0xff]  ;;  %v2118_v5 = vld [vmem:[%s2695_s0 + $0x30] sm:$0xff]  ;;  %v2123_v6 = vld [vmem:[%s2695_s0 + $0x38] sm:$0xff] }
   0x3   :  { %v1731_v7 = vpack.i.bf16 %v2113_v4, %v2106_v2  ;;  %v2130_v8 = vld [vmem:[%s2695_s0 + $0x20] sm:$0xff]  ;;  %v2135_v9 = vld [vmem:[%s2695_s0 + $0x28] sm:$0xff]  ;;  %v1746_v10 = vpack.i.bf16 %v2123_v6, %v2118_v5 }
   0x4   :  { %1742 = vrot.lane.b32.xlu1 %v1741_v3, %s2043_s17  ;;  %v1736_v11 = vpack.i.bf16 %v2135_v9, %v2130_v8 }
   0x5   :  { %1732 = vrot.lane.b32.xlu0 %v1731_v7, %s2043_s17 }
   0x8   :  { %1747 = vrot.lane.b32.xlu1 %v1746_v10, %s2043_s17 }
   0x9   :  { %1737 = vrot.lane.b32.xlu0 %v1736_v11, %s2043_s17 }
   0xc   :  { %1757 = vrot.lane.b32.xlu1 %v1736_v11, %s2044_s18 }
   0xd   :  { %1752 = vrot.lane.b32.xlu0 %v1731_v7, %s2044_s18 }
  0x10   :  { %1767 = vrot.lane.b32.xlu1 %v1746_v10, %s2044_s18 }
  0x11   :  { %1762 = vrot.lane.b32.xlu0 %v1741_v3, %s2044_s18 }
  0x12   :  { %12 = vsyncpa [#allocation3], 0  ;;  %v2045_v12 = vmov 0   ;;  %v167_v13 = vld [vmem:[%s2697_s2 + $0x28] sm:$0xff]  ;;  %v166_v14 = vld [vmem:[%s2697_s2 + $0x20] sm:$0xff]  ;;  %v37_v25 = vlaneseq  ;;  %v155_v55 = vpack.c.bf16 %v2135_v9, %v2130_v8  ;;  %v154_v63 = vpack.c.bf16 %v2113_v4, %v2106_v2  ;;  %s2046_s30 = smov 2  }
  0x13   :  { %275 = vmatprep.mubr.bf16.mxu0 %v2045_v12  ;;  %1772 = vset.pattern.permute.xlu1 %v2045_v12  ;;  %v168_v15 = vld [vmem:[%s2697_s2 + $0x30] sm:$0xff]  ;;  %v169_v16 = vld [vmem:[%s2697_s2 + $0x38] sm:$0xff]  ;;  %v162_v17 = vld [vmem:[%s2697_s2] sm:$0xff]  ;;  %v157_v10 = vpack.c.bf16 %v2123_v6, %v2118_v5  ;;  %vm230_vm9 = vcmask 785408   ;;  %vm460_vm10 = vcmask 261120   ;;  %s2047_s12 = smov 126  }
  0x14   :  { %1771 = vset.pattern.permute.xlu0 %v2045_v12  ;;  %505 = vmatprep.mubr.bf16.mxu1 %v2045_v12  ;;  %v163_v18 = vld [vmem:[%s2697_s2 + $0x8] sm:$0xff]  ;;  %v164_v19 = vld [vmem:[%s2697_s2 + $0x10] sm:$0xff]  ;;  %v165_v20 = vld [vmem:[%s2697_s2 + $0x18] sm:$0xff]  ;;  %v2181_v26 = vand.u32 127, %v37_v25  ;;  %s2049_s28 = smov 124  }
  0x15   :  { %197 = vperm.xlu1 %1772, %v167_v13   ;;  %192 = vperm.xlu0 %1771, %v166_v14   ;;  %v392_v21 = vld [vmem:[%s2699_s4] sm:$0xff]  ;;  %v393_v22 = vld [vmem:[%s2699_s4 + $0x8] sm:$0xff]  ;;  %v394_v23 = vld [vmem:[%s2699_s4 + $0x10] sm:$0xff] }
  0x16   :  { %v395_v24 = vld [vmem:[%s2699_s4 + $0x18] sm:$0xff]  ;;  %v39_v27 = vadd.s32 128, %v2181_v26  ;;  %vm92_vm0 = vcmp.lt.s32.totalorder %v2181_v26, 1  ;;  %vm68_vm2 = vcmp.ge.s32.totalorder %v2181_v26, 1  ;;  %vm70_vm5 = vcmp.lt.s32.totalorder %v2181_v26, 127 }
  0x17   :  { %vm2201_vm4 = vmpackc.low %vm68_vm2, %vm68_vm2  ;;  %vm578_vm11 = vcmp.lt.s32.totalorder %v2181_v26, 2  ;;  %vm66_vm13 = vcmp.ge.s32.totalorder %v2181_v26, 2 }
  0x18   :  { %v2184_v30 = vand.u32 127, %v39_v27  ;;  %vm1512_vm8 = vmpackc.low %vm70_vm5, %vm70_vm5 }
  0x19   :  { %202 = vperm.xlu1 %1772, %v168_v15   ;;  %207 = vperm.xlu0 %1771, %v169_v16   ;;  %v156_v16 = vpack.c.bf16 %v2101_v1, %v2096_v0  ;;  %vm2368_vm15 = vmpackc.low %vm66_vm13, %vm66_vm13 }
  0x1a   :  { %vm69_vm1 = vcmp.ge.s32.totalorder %v2184_v30, 1  ;;  %vm71_vm6 = vcmp.lt.s32.totalorder %v2184_v30, 127  ;;  %vm67_vm12 = vcmp.ge.s32.totalorder %v2184_v30, 2 }
  0x1b   :  { %vm1497_vm3 = vmpackc.low %vm69_vm1, %vm69_vm1  ;;  %vm73_vm1 = vcmp.lt.s32.totalorder %v2184_v30, 126 }
  0x1c   :  { %vm1509_vm7 = vmpackc.low %vm71_vm6, %vm71_vm6  ;;  %vm64_vm6 = vcmp.ge.s32.totalorder %v2181_v26, 4 }
  0x1d   :  { %172 = vperm.xlu1 %1772, %v162_v17   ;;  %177 = vperm.xlu0 %1771, %v163_v18   ;;  %vm2364_vm14 = vmpackc.low %vm67_vm12, %vm67_vm12  ;;  %vm75_vm12 = vcmp.lt.s32.totalorder %v2184_v30, 124 }
  0x1e   :  { %vm1573_vm2 = vmpackc.low %vm73_vm1, %vm73_vm1 }
  0x1f   :  { %vm1653_vm13 = vmpackc.low %vm75_vm12, %vm75_vm12 }
  0x21   :  { %182 = vperm.xlu1 %1772, %v164_v19   ;;  %187 = vperm.xlu0 %1771, %v165_v20  }
  0x25   :  { %402 = vperm.xlu1 %1772, %v392_v21   ;;  %407 = vperm.xlu0 %1771, %v393_v22  }
  0x29   :  { %412 = vperm.xlu1 %1772, %v394_v23   ;;  %417 = vperm.xlu0 %1771, %v395_v24  }
  0x76   :  { %v1743_v28 = vpop.permute.xlu1 %1742 }
  0x77   :  { %v1733_v29 = vpop.permute.xlu0 %1732  ;;  %v1745_v31 = vunpack.i.h.bf16 %v1743_v28  ;;  %v1744_v32 = vunpack.i.l.bf16 %v1743_v28  ;;  %v1853_v28 = vld [vmem:[%s2696_s1] sm:$0xff]  }
  0x78   :  { %v1735_v37 = vunpack.i.h.bf16 %v1733_v29  ;;  %v1734_v38 = vunpack.i.l.bf16 %v1733_v29  ;;  %v1854_v29 = vld [vmem:[%s2696_s1 + $0x8] sm:$0xff]  }
  0x7a   :  { %v1748_v33 = vpop.permute.xlu1 %1747 }
  0x7b   :  { %v1750_v34 = vunpack.i.h.bf16 %v1748_v33  ;;  %v1749_v35 = vunpack.i.l.bf16 %v1748_v33  ;;  %v1738_v36 = vpop.permute.xlu0 %1737 }
  0x7c   :  { %v1740_v39 = vunpack.i.h.bf16 %v1738_v36  ;;  %v1739_v40 = vunpack.i.l.bf16 %v1738_v36 }
  0x7d   :  { %v95_v41 = vsel %vm92_vm0, %v1744_v32, %v1749_v35  ;;  %v96_v42 = vsel %vm92_vm0, %v1745_v31, %v1750_v34  ;;  %v99_v52 = vsel %vm92_vm0, %v1749_v35, %v1744_v32  ;;  %v100_v53 = vsel %vm92_vm0, %v1750_v34, %v1745_v31  ;;  %v1855_v31 = vld [vmem:[%s2696_s1 + $0x10] sm:$0xff]   ;;  %v1856_v32 = vld [vmem:[%s2696_s1 + $0x18] sm:$0xff]  }
  0x7e   :  { %v93_v43 = vsel %vm92_vm0, %v1734_v38, %v1739_v40  ;;  %v94_v44 = vsel %vm92_vm0, %v1735_v37, %v1740_v39  ;;  %v97_v46 = vsel %vm92_vm0, %v1739_v40, %v1734_v38  ;;  %v98_v47 = vsel %vm92_vm0, %v1740_v39, %v1735_v37  ;;  %v1758_v49 = vpop.permute.xlu1 %1757 }
  0x7f   :  { %v1498_v45 = vpack.c.bf16 %v94_v44, %v93_v43  ;;  %v1753_v50 = vpop.permute.xlu0 %1752  ;;  %v1501_v51 = vpack.c.bf16 %v98_v47, %v97_v46  ;;  %v1504_v54 = vpack.c.bf16 %v96_v42, %v95_v41  ;;  %v1760_v56 = vunpack.i.h.bf16 %v1758_v49 }
  0x80   :  { %v1759_v57 = vunpack.i.l.bf16 %v1758_v49  ;;  %v1755_v58 = vunpack.i.h.bf16 %v1753_v50  ;;  %v1754_v59 = vunpack.i.l.bf16 %v1753_v50  ;;  %v1507_v60 = vpack.c.bf16 %v100_v53, %v99_v52 }
  0x81   :  { %1499 = vmatprep.subr.msk.bf16.mxu0 %vm1497_vm3, %v1498_v45  ;;  %vm72_vm0 = vcmp.lt.s32.totalorder %v2181_v26, 126 }
  0x82   :  { %1502 = vmatpush1.bf16.msk.msra.mxu0 %vm2201_vm4, %v1501_v51  ;;  %v1768_v61 = vpop.permute.xlu1 %1767  ;;  %v131_v3 = vsel %vm70_vm5, %v1760_v56, %v1755_v58  ;;  %v130_v7 = vsel %vm70_vm5, %v1759_v57, %v1754_v59  ;;  %v127_v17 = vsel %vm70_vm5, %v1755_v58, %v1760_v56  ;;  %v126_v18 = vsel %vm70_vm5, %v1754_v59, %v1759_v57 }
  0x83   :  { %1505 = vmatprep.subr.msk.bf16.mxu0 %vm1497_vm3, %v1504_v54  ;;  %v1763_v62 = vpop.permute.xlu0 %1762  ;;  %v1770_v11 = vunpack.i.h.bf16 %v1768_v61  ;;  %v1769_v13 = vunpack.i.l.bf16 %v1768_v61  ;;  %v1510_v19 = vpack.c.bf16 %v131_v3, %v130_v7  ;;  %v1513_v22 = vpack.c.bf16 %v127_v17, %v126_v18  ;;  %vm1576_vm3 = vmpackc.low %vm72_vm0, %vm72_vm0 }
  0x84   :  { %v1765_v14 = vunpack.i.h.bf16 %v1763_v62  ;;  %v1764_v15 = vunpack.i.l.bf16 %v1763_v62 }
  0x86   :  { %1508 = vmatpush1.bf16.msk.msra.mxu0 %vm2201_vm4, %v1507_v60  ;;  %v133_v20 = vsel %vm70_vm5, %v1770_v11, %v1765_v14  ;;  %v132_v21 = vsel %vm70_vm5, %v1769_v13, %v1764_v15  ;;  %v129_v23 = vsel %vm70_vm5, %v1765_v14, %v1770_v11  ;;  %v128_v24 = vsel %vm70_vm5, %v1764_v15, %v1769_v13 }
  0x87   :  { %247 = vmatprep.subr.bf16.mxu0 %v155_v55  ;;  %v1516_v25 = vpack.c.bf16 %v133_v20, %v132_v21  ;;  %v1519_v27 = vpack.c.bf16 %v129_v23, %v128_v24  ;;  %vm1066_vm4 = vcmp.lt.s32.totalorder %v2181_v26, 4  ;;  %vm65_vm5 = vcmp.ge.s32.totalorder %v2184_v30, 4 }
  0x8a   :  { %248 = vmatpush1.bf16.msra.mxu0 %v154_v63 }
  0x8b   :  { %249 = vmatprep.subr.bf16.mxu0 %v157_v10 }
  0x8e   :  { %250 = vmatpush1.bf16.msra.mxu0 %v156_v16 }
  0x8f   :  { %1511 = vmatprep.subr.msk.bf16.mxu0 %vm1509_vm7, %v1510_v19 }
  0x92   :  { %1514 = vmatpush1.bf16.msk.msra.mxu0 %vm1512_vm8, %v1513_v22 }
  0x93   :  { %1517 = vmatprep.subr.msk.bf16.mxu0 %vm1509_vm7, %v1516_v25  ;;  %vm2586_vm7 = vmpackc.low %vm65_vm5, %vm65_vm5 }
  0x94   :  { %v198_v37 = vpop.permute.xlu1 %197  ;;  %v193_v39 = vpop.permute.xlu0 %192 }
  0x96   :  { %1520 = vmatpush1.bf16.msk.msra.mxu0 %vm1512_vm8, %v1519_v27  ;;  %vm2590_vm8 = vmpackc.low %vm64_vm6, %vm64_vm6 }
  0x98   :  { %v203_v43 = vpop.permute.xlu1 %202  ;;  %v208_v44 = vpop.permute.xlu0 %207 }
  0x99   :  { %1521 = vmatmul.mubr.msk.bf16.vlgmr.msra.gmra.mrb[0].mxu0 %vm230_vm9, %v1853_v28 }
  0x9a   :  { %285 = vmatprep.mubr.bf16.mxu0 %v2045_v12 }
  0x9c   :  { %v173_v50 = vpop.permute.xlu1 %172  ;;  %v178_v56 = vpop.permute.xlu0 %177 }
  0xa0   :  { %v183_v21 = vpop.permute.xlu1 %182  ;;  %v188_v25 = vpop.permute.xlu0 %187 }
  0xa1   :  { %1522 = vmatmul.mubr.msk.bf16.gmra.mrb[4].mxu0 %vm230_vm9, %v1854_v29 }
  0xa2   :  { %295 = vmatprep.mubr.bf16.mxu0 %v2045_v12 }
  0xa9   :  { %1523 = vmatmul.mubr.msk.bf16.gmra.mrb[8].mxu0 %vm230_vm9, %v1855_v31 }
  0xaa   :  { %305 = vmatprep.mubr.bf16.mxu0 %v2045_v12 }
  0xb1   :  { %1524 = vmatmul.mubr.msk.bf16.gmra.mrb[12].mxu0 %vm230_vm9, %v1856_v32 }
  0xb2   :  { %1250 = vmatprep.mubr.bf16.mxu0 %v2045_v12 }
 0x16c   :  { %v277_v33 = vpop.f32.mrb[0].mxu0 }
 0x16d   :  { %v279_v34 = vpop.f32.mrb[1].mxu0  ;;  %v278_v58 = vadd.f32 %v277_v33, %v173_v50 }
 0x16e   :  { %v281_v35 = vpop.f32.mrb[2].mxu0  ;;  %v280_v60 = vadd.f32 %v279_v34, %v173_v50 }
 0x16f   :  { %v283_v36 = vpop.f32.mrb[3].mxu0  ;;  %v282_v61 = vadd.f32 %v281_v35, %v178_v56 }
 0x170   :  { %v284_v17 = vadd.f32 %v283_v36, %v178_v56 }
 0x174   :  { %v287_v38 = vpop.f32.mrb[4].mxu0 }
 0x175   :  { %v289_v40 = vpop.f32.mrb[5].mxu0  ;;  %v288_v29 = vadd.f32 %v287_v38, %v183_v21 }
 0x176   :  { %v291_v41 = vpop.f32.mrb[6].mxu0  ;;  %v290_v32 = vadd.f32 %v289_v40, %v183_v21 }
 0x177   :  { %v2262_v42 = vpop.f32.mrb[7].mxu0  ;;  %v292_v35 = vadd.f32 %v291_v41, %v188_v25 }
 0x17c   :  { %v297_v45 = vpop.f32.mrb[8].mxu0 }
 0x17d   :  { %v298_v46 = vadd.f32 %v297_v45, %v193_v39  ;;  %v299_v47 = vpop.f32.mrb[9].mxu0 }
 0x17e   :  { %v300_v48 = vadd.f32 %v299_v47, %v193_v39  ;;  %v301_v49 = vpop.f32.mrb[10].mxu0 }
 0x17f   :  { %v1525_v51 = vmul.f32 -1.442695, %v298_v46  ;;  %v302_v52 = vadd.f32 %v301_v49, %v198_v37  ;;  %v303_v53 = vpop.f32.mrb[11].mxu0 }
 0x180   :  { %v1526_v54 = vmul.f32 -1.442695, %v300_v48  ;;  %v304_v55 = vadd.f32 %v303_v53, %v198_v37  ;;  %v294_v37 = vadd.f32 %v2262_v42, %v188_v25 }
 0x181   :  { %1875 = vpow2.f32 %v1525_v51  ;;  %v1527_v57 = vmul.f32 -1.442695, %v302_v52 }
 0x182   :  { %1877 = vpow2.f32 %v1526_v54  ;;  %v1528_v59 = vmul.f32 -1.442695, %v304_v55 }
 0x183   :  { %1879 = vpow2.f32 %v1527_v57 }
 0x184   :  { %1881 = vpow2.f32 %v1528_v59  ;;  %v307_v62 = vpop.f32.mrb[12].mxu0 }
 0x185   :  { %v308_v63 = vadd.f32 %v307_v62, %v203_v43  ;;  %v309_v3 = vpop.f32.mrb[13].mxu0  ;;  %1883 = vtanh.f32 %v278_v58 }
 0x186   :  { %v310_v7 = vadd.f32 %v309_v3, %v203_v43  ;;  %v311_v10 = vpop.f32.mrb[14].mxu0  ;;  %1885 = vtanh.f32 %v280_v60 }
 0x187   :  { %v1529_v11 = vmul.f32 -1.442695, %v308_v63  ;;  %v312_v13 = vadd.f32 %v311_v10, %v208_v44  ;;  %v313_v14 = vpop.f32.mrb[15].mxu0  ;;  %1887 = vtanh.f32 %v282_v61 }
 0x188   :  { %v1530_v15 = vmul.f32 -1.442695, %v310_v7  ;;  %v314_v16 = vadd.f32 %v313_v14, %v208_v44 }
 0x189   :  { %1889 = vpow2.f32 %v1529_v11  ;;  %v1531_v18 = vmul.f32 -1.442695, %v312_v13 }
 0x18a   :  { %1891 = vpow2.f32 %v1530_v15  ;;  %v1532_v19 = vmul.f32 -1.442695, %v314_v16 }
 0x18b   :  { %v1876_v20 = vpop.eup %1875  ;;  %1893 = vpow2.f32 %v1531_v18  ;;  %v1858_v18 = vld [vmem:[%s2698_s3 + $0x8] sm:$0xff]  }
 0x18c   :  { %v1878_v22 = vpop.eup %1877  ;;  %v348_v23 = vadd.f32 1.0, %v1876_v20  ;;  %1895 = vpow2.f32 %v1532_v19  ;;  %v403_v19 = vpop.permute.xlu1 %402 }
 0x18d   :  { %v1880_v24 = vpop.eup %1879  ;;  %1897 = vtanh.f32 %v284_v17  ;;  %v349_v27 = vadd.f32 1.0, %v1878_v22  ;;  %v1857_v17 = vld [vmem:[%s2698_s3] sm:$0xff]  }
 0x18e   :  { %v1882_v28 = vpop.eup %1881  ;;  %1899 = vrcp.f32 %v348_v23  ;;  %v350_v31 = vadd.f32 1.0, %v1880_v24  ;;  %v408_v23 = vpop.permute.xlu0 %407 }
 0x18f   :  { %1901 = vrcp.f32 %v349_v27  ;;  %v351_v33 = vadd.f32 1.0, %v1882_v28  ;;  %v1884_v34 = vpop.eup %1883 }
 0x190   :  { %1903 = vrcp.f32 %v350_v31  ;;  %v1886_v36 = vpop.eup %1885 }
 0x191   :  { %1905 = vrcp.f32 %v351_v33  ;;  %v1888_v39 = vpop.eup %1887 }
 0x192   :  { %1907 = vtanh.f32 %v288_v29 }
 0x193   :  { %v1890_v43 = vpop.eup %1889  ;;  %1909 = vtanh.f32 %v290_v32 }
 0x194   :  { %v1892_v44 = vpop.eup %1891  ;;  %1911 = vtanh.f32 %v292_v35  ;;  %v352_v45 = vadd.f32 1.0, %v1890_v43 }
 0x195   :  { %v1894_v38 = vpop.eup %1893  ;;  %1913 = vtanh.f32 %v294_v37  ;;  %v353_v46 = vadd.f32 1.0, %v1892_v44 }
 0x196   :  { %v1896_v40 = vpop.eup %1895  ;;  %1915 = vrcp.f32 %v352_v45  ;;  %v354_v47 = vadd.f32 1.0, %v1894_v38 }
 0x197   :  { %v1898_v48 = vpop.eup %1897  ;;  %1917 = vrcp.f32 %v353_v46  ;;  %v355_v41 = vadd.f32 1.0, %v1896_v40 }
 0x198   :  { %v1900_v49 = vpop.eup %1899  ;;  %1919 = vrcp.f32 %v354_v47  ;;  %v1859_v47 = vld [vmem:[%s2698_s3 + $0x10] sm:$0xff]  }
 0x199   :  { %v1902_v42 = vpop.eup %1901  ;;  %1921 = vrcp.f32 %v355_v41  ;;  %v372_v50 = vmul.f32 %v1900_v49, %v1884_v34 }
 0x19a   :  { %v1904_v51 = vpop.eup %1903  ;;  %v373_v52 = vmul.f32 %v1902_v42, %v1886_v36  ;;  %v413_v36 = vpop.permute.xlu1 %412  ;;  %v1555_v42 = vld [vmem:[%s2697_s2 + $0x70] sm:$0xff] }
 0x19b   :  { %v1906_v53 = vpop.eup %1905  ;;  %v374_v54 = vmul.f32 %v1904_v51, %v1888_v39  ;;  %v1549_v51 = vld [vmem:[%s2697_s2 + $0x40] sm:$0xff] }
 0x19c   :  { %v1908_v55 = vpop.eup %1907  ;;  %v375_v56 = vmul.f32 %v1906_v53, %v1898_v48  ;;  %v1551_v53 = vld [vmem:[%s2697_s2 + $0x50] sm:$0xff] }
 0x19d   :  { %v1910_v57 = vpop.eup %1909  ;;  %v380_v58 = vpack.c.bf16 %v374_v54, %v372_v50  ;;  %v1556_v50 = vld [vmem:[%s2697_s2 + $0x78] sm:$0xff] }
 0x19e   :  { %v1912_v59 = vpop.eup %1911  ;;  %v381_v60 = vpack.c.bf16 %v375_v56, %v373_v52  ;;  %v1550_v52 = vld [vmem:[%s2697_s2 + $0x48] sm:$0xff]  ;;  %v1552_v54 = vld [vmem:[%s2697_s2 + $0x58] sm:$0xff] }
 0x19f   :  { %v1914_v61 = vpop.eup %1913  ;;  %v1606_v56 = vld [vmem:[%s2699_s4 + $0x48] sm:$0xff] }
 0x1a0   :  { %v1916_v62 = vpop.eup %1915  ;;  %473 = vmatprep.subr.bf16.mxu1 %v381_v60 }
 0x1a1   :  { %v1918_v63 = vpop.eup %1917  ;;  %474 = vmatpush1.bf16.msra.mxu1 %v380_v58  ;;  %v376_v3 = vmul.f32 %v1916_v62, %v1908_v55  ;;  %v1605_v55 = vld [vmem:[%s2699_s4 + $0x40] sm:$0xff]  ;;  %v1608_v58 = vld [vmem:[%s2699_s4 + $0x58] sm:$0xff] }
 0x1a2   :  { %v1920_v7 = vpop.eup %1919  ;;  %v377_v10 = vmul.f32 %v1918_v63, %v1910_v57  ;;  %v1607_v57 = vld [vmem:[%s2699_s4 + $0x50] sm:$0xff] }
 0x1a3   :  { %v1922_v11 = vpop.eup %1921  ;;  %v378_v13 = vmul.f32 %v1920_v7, %v1912_v59 }
 0x1a4   :  { %v379_v14 = vmul.f32 %v1922_v11, %v1914_v61 }
 0x1a5   :  { %v382_v15 = vpack.c.bf16 %v378_v13, %v376_v3 }
 0x1a6   :  { %v383_v16 = vpack.c.bf16 %v379_v14, %v377_v10 }
 0x1a8   :  { %475 = vmatprep.subr.bf16.mxu1 %v383_v16 }
 0x1a9   :  { %476 = vmatpush1.bf16.msra.mxu1 %v382_v15 }
 0x1ac   :  { %1537 = vmatmul.mubr.msk.bf16.vlgmr.msra.gmra.mrb[0].mxu1 %vm460_vm10, %v1857_v17 }
 0x1ad   :  { %515 = vmatprep.mubr.bf16.mxu1 %v2045_v12 }
 0x1b4   :  { %1538 = vmatmul.mubr.msk.bf16.gmra.mrb[4].mxu1 %vm460_vm10, %v1858_v18 }
 0x1b5   :  { %525 = vmatprep.mubr.bf16.mxu1 %v2045_v12 }
 0x1bc   :  { %1539 = vmatmul.mubr.msk.bf16.gmra.mrb[8].mxu1 %vm460_vm10, %v1859_v47 }
 0x1bd   :  { %535 = vmatprep.mubr.bf16.mxu1 %v2045_v12 }
 0x27f   :  { %v507_v20 = vpop.f32.mrb[0].mxu1 }
 0x280   :  { %v508_v21 = vadd.f32 %v507_v20, %v403_v19  ;;  %v509_v22 = vpop.f32.mrb[1].mxu1 }
 0x281   :  { %v510_v24 = vadd.f32 %v509_v22, %v403_v19  ;;  %v511_v25 = vpop.f32.mrb[2].mxu1 }
 0x282   :  { %v512_v27 = vadd.f32 %v511_v25, %v408_v23  ;;  %v513_v28 = vpop.f32.mrb[3].mxu1  ;;  %v2276_v31 = vadd.f32 %v508_v21, %v2106_v2 }
 0x283   :  { %v514_v29 = vadd.f32 %v513_v28, %v408_v23  ;;  %v2282_v33 = vadd.f32 %v2130_v8, %v510_v24 }
 0x284   :  { %v2279_v32 = vadd.f32 %v512_v27, %v2113_v4  ;;  %v418_v4 = vpop.permute.xlu0 %417 }
 0x285   :  { %v2285_v34 = vadd.f32 %v2135_v9, %v514_v29 }
 0x286   :  { %v1773_v35 = vpack.i.bf16 %v2279_v32, %v2276_v31 }
 0x287   :  { %v517_v37 = vpop.f32.mrb[4].mxu1  ;;  %v1778_v39 = vpack.i.bf16 %v2285_v34, %v2282_v33 }
 0x288   :  { %v518_v43 = vadd.f32 %v517_v37, %v413_v36  ;;  %v519_v2 = vpop.f32.mrb[5].mxu1  ;;  %1774 = vrot.lane.b32.xlu1 %v1773_v35, %s2046_s30 }
 0x289   :  { %v520_v44 = vadd.f32 %v519_v2, %v413_v36  ;;  %v521_v45 = vpop.f32.mrb[6].mxu1  ;;  %1779 = vrot.lane.b32.xlu0 %v1778_v39, %s2046_s30 }
 0x28a   :  { %v522_v8 = vadd.f32 %v521_v45, %v418_v4  ;;  %v523_v38 = vpop.f32.mrb[7].mxu1  ;;  %v2292_v46 = vadd.f32 %v518_v43, %v2096_v0 }
 0x28b   :  { %v524_v9 = vadd.f32 %v523_v38, %v418_v4  ;;  %v2301_v48 = vadd.f32 %v2118_v5, %v520_v44  ;;  %v1553_v5 = vld [vmem:[%s2697_s2 + $0x60] sm:$0xff]  ;;  %v641_v38 = vpack.c.bf16 %v2279_v32, %v2276_v31 }
 0x28c   :  { %v2295_v40 = vadd.f32 %v522_v8, %v2101_v1  ;;  %v1860_v1 = vld [vmem:[%s2698_s3 + $0x18] sm:$0xff]  }
 0x28d   :  { %v2304_v41 = vadd.f32 %v2123_v6, %v524_v9  ;;  %1540 = vmatmul.mubr.msk.bf16.gmra.mrb[12].mxu1 %vm460_vm10, %v1860_v1  ;;  %v1554_v6 = vld [vmem:[%s2697_s2 + $0x68] sm:$0xff] }
 0x28e   :  { %v1783_v49 = vpack.i.bf16 %v2295_v40, %v2292_v46  ;;  %762 = vmatprep.mubr.bf16.mxu1 %v2045_v12 }
 0x28f   :  { %v1788_v0 = vpack.i.bf16 %v2304_v41, %v2301_v48 }
 0x290   :  { %1784 = vrot.lane.b32.xlu1 %v1783_v49, %s2046_s30 }
 0x291   :  { %1789 = vrot.lane.b32.xlu0 %v1788_v0, %s2046_s30 }
 0x294   :  { %1794 = vrot.lane.b32.xlu1 %v1773_v35, %s2047_s12 }
 0x295   :  { %1799 = vrot.lane.b32.xlu0 %v1778_v39, %s2047_s12  ;;  %v642_v39 = vpack.c.bf16 %v2285_v34, %v2282_v33 }
 0x298   :  { %1804 = vrot.lane.b32.xlu1 %v1783_v49, %s2047_s12  ;;  %v644_v49 = vpack.c.bf16 %v2304_v41, %v2301_v48 }
 0x299   :  { %1809 = vrot.lane.b32.xlu0 %v1788_v0, %s2047_s12 }
 0x29c   :  { %680 = vperm.xlu1 %1772, %v1553_v5  }
 0x29d   :  { %685 = vperm.xlu0 %1771, %v1554_v6  }
 0x2a0   :  { %690 = vperm.xlu1 %1772, %v1555_v42   ;;  %v643_v42 = vpack.c.bf16 %v2295_v40, %v2292_v46 }
 0x2a1   :  { %695 = vperm.xlu0 %1771, %v1556_v50  }
 0x2a4   :  { %660 = vperm.xlu1 %1772, %v1549_v51  }
 0x2a5   :  { %665 = vperm.xlu0 %1771, %v1550_v52  }
 0x2a8   :  { %670 = vperm.xlu1 %1772, %v1551_v53  }
 0x2a9   :  { %675 = vperm.xlu0 %1771, %v1552_v54  }
 0x2ac   :  { %891 = vperm.xlu1 %1772, %v1605_v55  }
 0x2ad   :  { %896 = vperm.xlu0 %1771, %v1606_v56  }
 0x2b0   :  { %901 = vperm.xlu1 %1772, %v1607_v57  }
 0x2b1   :  { %906 = vperm.xlu0 %1771, %v1608_v58  }
 0x2fa   :  { %v1775_v59 = vpop.permute.xlu1 %1774 }
 0x2fb   :  { %v1777_v60 = vunpack.i.h.bf16 %v1775_v59  ;;  %v1776_v61 = vunpack.i.l.bf16 %v1775_v59  ;;  %v1780_v62 = vpop.permute.xlu0 %1779 }
 0x2fc   :  { %v1782_v63 = vunpack.i.h.bf16 %v1780_v62  ;;  %v1781_v3 = vunpack.i.l.bf16 %v1780_v62  ;;  %v1863_v62 = vld [vmem:[%s2696_s1 + $0x30] sm:$0xff]  }
 0x2fe   :  { %v579_v7 = vsel %vm578_vm11, %v1776_v61, %v1781_v3  ;;  %v580_v10 = vsel %vm578_vm11, %v1777_v60, %v1782_v63  ;;  %v583_v11 = vsel %vm578_vm11, %v1781_v3, %v1776_v61  ;;  %v584_v13 = vsel %vm578_vm11, %v1782_v63, %v1777_v60  ;;  %v1861_v60 = vld [vmem:[%s2696_s1 + $0x20] sm:$0xff]   ;;  %v1862_v61 = vld [vmem:[%s2696_s1 + $0x28] sm:$0xff]   ;;  %v1864_v63 = vld [vmem:[%s2696_s1 + $0x38] sm:$0xff]  }
 0x2ff   :  { %v1562_v15 = vpack.c.bf16 %v580_v10, %v579_v7  ;;  %v1565_v16 = vpack.c.bf16 %v584_v13, %v583_v11 }
 0x301   :  { %1563 = vmatprep.subr.msk.bf16.mxu1 %vm2364_vm14, %v1562_v15 }
 0x302   :  { %v1785_v18 = vpop.permute.xlu1 %1784  ;;  %1566 = vmatpush1.bf16.msk.msra.mxu1 %vm2368_vm15, %v1565_v16 }
 0x303   :  { %v1787_v19 = vunpack.i.h.bf16 %v1785_v18  ;;  %v1786_v20 = vunpack.i.l.bf16 %v1785_v18  ;;  %v1790_v21 = vpop.permute.xlu0 %1789 }
 0x304   :  { %v1792_v22 = vunpack.i.h.bf16 %v1790_v21  ;;  %v1791_v23 = vunpack.i.l.bf16 %v1790_v21 }
 0x306   :  { %v581_v24 = vsel %vm578_vm11, %v1786_v20, %v1791_v23  ;;  %v582_v25 = vsel %vm578_vm11, %v1787_v19, %v1792_v22  ;;  %v585_v27 = vsel %vm578_vm11, %v1791_v23, %v1786_v20  ;;  %v586_v28 = vsel %vm578_vm11, %v1792_v22, %v1787_v19  ;;  %v1795_v29 = vpop.permute.xlu1 %1794 }
 0x307   :  { %v1568_v35 = vpack.c.bf16 %v582_v25, %v581_v24  ;;  %v1571_v36 = vpack.c.bf16 %v586_v28, %v585_v27  ;;  %v1800_v37 = vpop.permute.xlu0 %1799  ;;  %v1797_v43 = vunpack.i.h.bf16 %v1795_v29  ;;  %v1796_v2 = vunpack.i.l.bf16 %v1795_v29 }
 0x308   :  { %v1802_v4 = vunpack.i.h.bf16 %v1800_v37  ;;  %v1801_v44 = vunpack.i.l.bf16 %v1800_v37  ;;  %vm74_vm11 = vcmp.lt.s32.totalorder %v2181_v26, 124  ;;  %v1871_v26 = vld [vmem:[%s2696_s1 + $0x50] sm:$0xff]  }
 0x309   :  { %1569 = vmatprep.subr.msk.bf16.mxu1 %vm2364_vm14, %v1568_v35  ;;  %vm1656_vm14 = vmpackc.low %vm74_vm11, %vm74_vm11 }
 0x30a   :  { %1572 = vmatpush1.bf16.msk.msra.mxu1 %vm2368_vm15, %v1571_v36  ;;  %v1805_v45 = vpop.permute.xlu1 %1804  ;;  %v616_v9 = vsel %vm72_vm0, %v1801_v44, %v1796_v2  ;;  %v617_v47 = vsel %vm72_vm0, %v1802_v4, %v1797_v43  ;;  %v612_v50 = vsel %vm72_vm0, %v1796_v2, %v1801_v44  ;;  %v613_v51 = vsel %vm72_vm0, %v1797_v43, %v1802_v4 }
 0x30b   :  { %v1810_v8 = vpop.permute.xlu0 %1809  ;;  %734 = vmatprep.subr.bf16.mxu1 %v642_v39  ;;  %v1807_v0 = vunpack.i.h.bf16 %v1805_v45  ;;  %v1806_v1 = vunpack.i.l.bf16 %v1805_v45  ;;  %v1574_v52 = vpack.c.bf16 %v617_v47, %v616_v9  ;;  %v1577_v55 = vpack.c.bf16 %v613_v51, %v612_v50 }
 0x30c   :  { %v1812_v5 = vunpack.i.h.bf16 %v1810_v8  ;;  %v1811_v6 = vunpack.i.l.bf16 %v1810_v8 }
 0x30e   :  { %735 = vmatpush1.bf16.msra.mxu1 %v641_v38  ;;  %v618_v53 = vsel %vm72_vm0, %v1811_v6, %v1806_v1  ;;  %v619_v54 = vsel %vm72_vm0, %v1812_v5, %v1807_v0  ;;  %v614_v56 = vsel %vm72_vm0, %v1806_v1, %v1811_v6  ;;  %v615_v57 = vsel %vm72_vm0, %v1807_v0, %v1812_v5 }
 0x30f   :  { %736 = vmatprep.subr.bf16.mxu1 %v644_v49  ;;  %v1580_v58 = vpack.c.bf16 %v619_v54, %v618_v53  ;;  %v1583_v59 = vpack.c.bf16 %v615_v57, %v614_v56 }
 0x312   :  { %737 = vmatpush1.bf16.msra.mxu1 %v643_v42 }
 0x313   :  { %1575 = vmatprep.subr.msk.bf16.mxu1 %vm1573_vm2, %v1574_v52 }
 0x316   :  { %1578 = vmatpush1.bf16.msk.msra.mxu1 %vm1576_vm3, %v1577_v55 }
 0x317   :  { %1581 = vmatprep.subr.msk.bf16.mxu1 %vm1573_vm2, %v1580_v58 }
 0x31a   :  { %1584 = vmatpush1.bf16.msk.msra.mxu1 %vm1576_vm3, %v1583_v59 }
 0x31b   :  { %v681_v14 = vpop.permute.xlu1 %680 }
 0x31c   :  { %v686_v17 = vpop.permute.xlu0 %685 }
 0x31d   :  { %1585 = vmatmul.mubr.msk.bf16.vlgmr.msra.gmra.mrb[16].mxu1 %vm230_vm9, %v1861_v60 }
 0x31e   :  { %772 = vmatprep.mubr.bf16.mxu1 %v2045_v12 }
 0x31f   :  { %v691_v19 = vpop.permute.xlu1 %690 }
 0x320   :  { %v696_v21 = vpop.permute.xlu0 %695 }
 0x323   :  { %v661_v37 = vpop.permute.xlu1 %660 }
 0x324   :  { %v666_v4 = vpop.permute.xlu0 %665 }
 0x325   :  { %1586 = vmatmul.mubr.msk.bf16.gmra.mrb[20].mxu1 %vm230_vm9, %v1862_v61 }
 0x326   :  { %782 = vmatprep.mubr.bf16.mxu1 %v2045_v12 }
 0x327   :  { %v671_v57 = vpop.permute.xlu1 %670 }
 0x32d   :  { %1587 = vmatmul.mubr.msk.bf16.gmra.mrb[24].mxu1 %vm230_vm9, %v1863_v62  ;;  %v676_v62 = vpop.permute.xlu0 %675 }
 0x32e   :  { %792 = vmatprep.mubr.bf16.mxu1 %v2045_v12 }
 0x335   :  { %1588 = vmatmul.mubr.msk.bf16.gmra.mrb[28].mxu1 %vm230_vm9, %v1864_v63 }
 0x336   :  { %993 = vmatprep.mubr.bf16.mxu1 %v2045_v12 }
 0x3f0   :  { %v764_v3 = vpop.f32.mrb[16].mxu1 }
 0x3f1   :  { %v766_v7 = vpop.f32.mrb[17].mxu1  ;;  %v765_v43 = vadd.f32 %v764_v3, %v661_v37 }
 0x3f2   :  { %v768_v10 = vpop.f32.mrb[18].mxu1  ;;  %v767_v44 = vadd.f32 %v766_v7, %v661_v37 }
 0x3f3   :  { %v770_v11 = vpop.f32.mrb[19].mxu1  ;;  %v769_v45 = vadd.f32 %v768_v10, %v666_v4 }
 0x3f4   :  { %v771_v50 = vadd.f32 %v770_v11, %v666_v4 }
 0x3f8   :  { %v774_v13 = vpop.f32.mrb[20].mxu1 }
 0x3f9   :  { %v776_v15 = vpop.f32.mrb[21].mxu1  ;;  %v775_v60 = vadd.f32 %v774_v13, %v671_v57 }
 0x3fa   :  { %v778_v16 = vpop.f32.mrb[22].mxu1  ;;  %v777_v63 = vadd.f32 %v776_v15, %v671_v57 }
 0x3fb   :  { %v2437_v18 = vpop.f32.mrb[23].mxu1  ;;  %v779_v10 = vadd.f32 %v778_v16, %v676_v62 }
 0x400   :  { %v784_v20 = vpop.f32.mrb[24].mxu1 }
 0x401   :  { %v785_v22 = vadd.f32 %v784_v20, %v681_v14  ;;  %v786_v23 = vpop.f32.mrb[25].mxu1 }
 0x402   :  { %v787_v24 = vadd.f32 %v786_v23, %v681_v14  ;;  %v788_v25 = vpop.f32.mrb[26].mxu1  ;;  %v781_v14 = vadd.f32 %v2437_v18, %v676_v62 }
 0x403   :  { %v1589_v27 = vmul.f32 -1.442695, %v785_v22  ;;  %v789_v28 = vadd.f32 %v788_v25, %v686_v17  ;;  %v790_v29 = vpop.f32.mrb[27].mxu1 }
 0x404   :  { %v1590_v35 = vmul.f32 -1.442695, %v787_v24  ;;  %v791_v36 = vadd.f32 %v790_v29, %v686_v17 }
 0x405   :  { %1923 = vpow2.f32 %v1589_v27  ;;  %v1591_v39 = vmul.f32 -1.442695, %v789_v28 }
 0x406   :  { %1925 = vpow2.f32 %v1590_v35  ;;  %v1592_v2 = vmul.f32 -1.442695, %v791_v36 }
 0x407   :  { %1927 = vpow2.f32 %v1591_v39 }
 0x408   :  { %1929 = vpow2.f32 %v1592_v2  ;;  %v794_v8 = vpop.f32.mrb[28].mxu1 }
 0x409   :  { %v795_v38 = vadd.f32 %v794_v8, %v691_v19  ;;  %v796_v9 = vpop.f32.mrb[29].mxu1  ;;  %1931 = vtanh.f32 %v765_v43 }
 0x40a   :  { %v797_v47 = vadd.f32 %v796_v9, %v691_v19  ;;  %v798_v49 = vpop.f32.mrb[30].mxu1  ;;  %1933 = vtanh.f32 %v767_v44 }
 0x40b   :  { %v1593_v0 = vmul.f32 -1.442695, %v795_v38  ;;  %v799_v1 = vadd.f32 %v798_v49, %v696_v21  ;;  %v800_v5 = vpop.f32.mrb[31].mxu1  ;;  %1935 = vtanh.f32 %v769_v45 }
 0x40c   :  { %v1594_v6 = vmul.f32 -1.442695, %v797_v47  ;;  %v801_v42 = vadd.f32 %v800_v5, %v696_v21 }
 0x40d   :  { %1937 = vpow2.f32 %v1593_v0  ;;  %v1595_v51 = vmul.f32 -1.442695, %v799_v1 }
 0x40e   :  { %1939 = vpow2.f32 %v1594_v6  ;;  %v1596_v52 = vmul.f32 -1.442695, %v801_v42 }
 0x40f   :  { %v1924_v53 = vpop.eup %1923  ;;  %1941 = vpow2.f32 %v1595_v51  ;;  %v1866_v51 = vld [vmem:[%s2698_s3 + $0x28] sm:$0xff]  }
 0x410   :  { %v1926_v54 = vpop.eup %1925  ;;  %v835_v55 = vadd.f32 1.0, %v1924_v53  ;;  %1943 = vpow2.f32 %v1596_v52  ;;  %v1867_v52 = vld [vmem:[%s2698_s3 + $0x30] sm:$0xff]   ;;  %v1868_v53 = vld [vmem:[%s2698_s3 + $0x38] sm:$0xff]  }
 0x411   :  { %v1928_v56 = vpop.eup %1927  ;;  %1945 = vtanh.f32 %v771_v50  ;;  %v836_v58 = vadd.f32 1.0, %v1926_v54  ;;  %v1865_v50 = vld [vmem:[%s2698_s3 + $0x20] sm:$0xff]   ;;  %v892_v54 = vpop.permute.xlu1 %891  ;;  %s2048_s3 = smov 4  }
 0x412   :  { %v1930_v59 = vpop.eup %1929  ;;  %1947 = vrcp.f32 %v835_v55  ;;  %v837_v61 = vadd.f32 1.0, %v1928_v56 }
 0x413   :  { %1949 = vrcp.f32 %v836_v58  ;;  %v838_v3 = vadd.f32 1.0, %v1930_v59  ;;  %v1932_v7 = vpop.eup %1931  ;;  %v897_v58 = vpop.permute.xlu0 %896 }
 0x414   :  { %1951 = vrcp.f32 %v837_v61  ;;  %v1934_v11 = vpop.eup %1933 }
 0x415   :  { %1953 = vrcp.f32 %v838_v3  ;;  %v1936_v17 = vpop.eup %1935 }
 0x416   :  { %1955 = vtanh.f32 %v775_v60 }
 0x417   :  { %v1938_v19 = vpop.eup %1937  ;;  %1957 = vtanh.f32 %v777_v63 }
 0x418   :  { %v1940_v20 = vpop.eup %1939  ;;  %1959 = vtanh.f32 %v779_v10  ;;  %v839_v13 = vadd.f32 1.0, %v1938_v19  ;;  %v902_v19 = vpop.permute.xlu1 %901 }
 0x419   :  { %v1942_v21 = vpop.eup %1941  ;;  %1961 = vtanh.f32 %v781_v14  ;;  %v840_v22 = vadd.f32 1.0, %v1940_v20 }
 0x41a   :  { %v1944_v15 = vpop.eup %1943  ;;  %1963 = vrcp.f32 %v839_v13  ;;  %v841_v23 = vadd.f32 1.0, %v1942_v21 }
 0x41b   :  { %v1946_v24 = vpop.eup %1945  ;;  %1965 = vrcp.f32 %v840_v22  ;;  %v842_v16 = vadd.f32 1.0, %v1944_v15 }
 0x41c   :  { %v1948_v25 = vpop.eup %1947  ;;  %1967 = vrcp.f32 %v841_v23 }
 0x41d   :  { %v1950_v18 = vpop.eup %1949  ;;  %1969 = vrcp.f32 %v842_v16  ;;  %v859_v27 = vmul.f32 %v1948_v25, %v1932_v7 }
 0x41e   :  { %v1952_v28 = vpop.eup %1951  ;;  %v860_v29 = vmul.f32 %v1950_v18, %v1934_v11 }
 0x41f   :  { %v1954_v35 = vpop.eup %1953  ;;  %v861_v36 = vmul.f32 %v1952_v28, %v1936_v17 }
 0x420   :  { %v1956_v37 = vpop.eup %1955  ;;  %v862_v39 = vmul.f32 %v1954_v35, %v1946_v24 }
 0x421   :  { %v1958_v43 = vpop.eup %1957  ;;  %v867_v2 = vpack.c.bf16 %v861_v36, %v859_v27 }
 0x422   :  { %v1960_v4 = vpop.eup %1959  ;;  %v868_v44 = vpack.c.bf16 %v862_v39, %v860_v29 }
 0x423   :  { %v1962_v45 = vpop.eup %1961 }
 0x424   :  { %v1964_v8 = vpop.eup %1963  ;;  %961 = vmatprep.subr.bf16.mxu1 %v868_v44  ;;  %v1634_v44 = vld [vmem:[%s2697_s2 + $0xa8] sm:$0xff] }
 0x425   :  { %v1966_v38 = vpop.eup %1965  ;;  %962 = vmatpush1.bf16.msra.mxu1 %v867_v2  ;;  %v863_v9 = vmul.f32 %v1964_v8, %v1956_v37  ;;  %v1633_v2 = vld [vmem:[%s2697_s2 + $0xa0] sm:$0xff]  ;;  %v1636_v8 = vld [vmem:[%s2697_s2 + $0xb8] sm:$0xff] }
 0x426   :  { %v1968_v47 = vpop.eup %1967  ;;  %v864_v49 = vmul.f32 %v1966_v38, %v1958_v43  ;;  %v1629_v38 = vld [vmem:[%s2697_s2 + $0x80] sm:$0xff] }
 0x427   :  { %v1970_v0 = vpop.eup %1969  ;;  %v865_v1 = vmul.f32 %v1968_v47, %v1960_v4  ;;  %v1631_v47 = vld [vmem:[%s2697_s2 + $0x90] sm:$0xff] }
 0x428   :  { %v866_v5 = vmul.f32 %v1970_v0, %v1962_v45  ;;  %v1635_v45 = vld [vmem:[%s2697_s2 + $0xb0] sm:$0xff]  ;;  %v396_v0 = vld [vmem:[%s2699_s4 + $0x20] sm:$0xff] }
 0x429   :  { %v869_v6 = vpack.c.bf16 %v865_v1, %v863_v9  ;;  %v1630_v9 = vld [vmem:[%s2697_s2 + $0x88] sm:$0xff] }
 0x42a   :  { %v870_v42 = vpack.c.bf16 %v866_v5, %v864_v49  ;;  %v1632_v49 = vld [vmem:[%s2697_s2 + $0x98] sm:$0xff]  ;;  %v397_v1 = vld [vmem:[%s2699_s4 + $0x28] sm:$0xff]  ;;  %v398_v5 = vld [vmem:[%s2699_s4 + $0x30] sm:$0xff] }
 0x42c   :  { %963 = vmatprep.subr.bf16.mxu1 %v870_v42  ;;  %v1609_v42 = vld [vmem:[%s2699_s4 + $0x60] sm:$0xff] }
 0x42d   :  { %964 = vmatpush1.bf16.msra.mxu1 %v869_v6  ;;  %v399_v6 = vld [vmem:[%s2699_s4 + $0x38] sm:$0xff] }
 0x430   :  { %1617 = vmatmul.mubr.msk.bf16.vlgmr.msra.gmra.mrb[32].mxu1 %vm460_vm10, %v1865_v50  ;;  %v1610_v50 = vld [vmem:[%s2699_s4 + $0x68] sm:$0xff] }
 0x431   :  { %1003 = vmatprep.mubr.bf16.mxu1 %v2045_v12 }
 0x438   :  { %1618 = vmatmul.mubr.msk.bf16.gmra.mrb[36].mxu1 %vm460_vm10, %v1866_v51  ;;  %v1611_v51 = vld [vmem:[%s2699_s4 + $0x70] sm:$0xff] }
 0x439   :  { %1013 = vmatprep.mubr.bf16.mxu1 %v2045_v12 }
 0x440   :  { %1619 = vmatmul.mubr.msk.bf16.gmra.mrb[8].mxu1 %vm460_vm10, %v1867_v52  ;;  %v1612_v52 = vld [vmem:[%s2699_s4 + $0x78] sm:$0xff] }
 0x441   :  { %1023 = vmatprep.mubr.bf16.mxu1 %v2045_v12 }
 0x448   :  { %1620 = vmatmul.mubr.msk.bf16.gmra.mrb[12].mxu1 %vm460_vm10, %v1868_v53  ;;  %v1363_v53 = vld [vmem:[%s2701_s6] sm:$0xff] }
 0x503   :  { %v995_v55 = vpop.f32.mrb[32].mxu1 }
 0x504   :  { %v996_v56 = vadd.f32 %v995_v55, %v892_v54  ;;  %v997_v57 = vpop.f32.mrb[33].mxu1  ;;  %v1365_v55 = vld [vmem:[%s2701_s6 + $0x10] sm:$0xff] }
 0x505   :  { %v998_v59 = vadd.f32 %v997_v57, %v892_v54  ;;  %v999_v60 = vpop.f32.mrb[34].mxu1  ;;  %v1364_v54 = vld [vmem:[%s2701_s6 + $0x8] sm:$0xff] }
 0x506   :  { %v1000_v61 = vadd.f32 %v999_v60, %v897_v58  ;;  %v1001_v62 = vpop.f32.mrb[35].mxu1  ;;  %v2460_v3 = vadd.f32 %v996_v56, %v2276_v31  ;;  %v1366_v56 = vld [vmem:[%s2701_s6 + $0x18] sm:$0xff] }
 0x507   :  { %v1002_v63 = vadd.f32 %v1001_v62, %v897_v58  ;;  %v2466_v10 = vadd.f32 %v998_v59, %v2282_v33 }
 0x508   :  { %v2463_v7 = vadd.f32 %v1000_v61, %v2279_v32 }
 0x509   :  { %v2469_v11 = vadd.f32 %v1002_v63, %v2285_v34  ;;  %v907_v34 = vpop.permute.xlu0 %906 }
 0x50a   :  { %v1129_v14 = vpack.c.bf16 %v2463_v7, %v2460_v3  ;;  %v1813_v17 = vpack.i.bf16 %v2463_v7, %v2460_v3 }
 0x50b   :  { %v1005_v20 = vpop.f32.mrb[36].mxu1  ;;  %v1818_v31 = vpack.i.bf16 %v2469_v11, %v2466_v10  ;;  %v1130_v32 = vpack.c.bf16 %v2469_v11, %v2466_v10 }
 0x50c   :  { %v1006_v13 = vadd.f32 %v1005_v20, %v902_v19  ;;  %v1007_v33 = vpop.f32.mrb[37].mxu1  ;;  %1814 = vrot.lane.b32.xlu1 %v1813_v17, %s2048_s3 }
 0x50d   :  { %v1008_v21 = vadd.f32 %v1007_v33, %v902_v19  ;;  %v1009_v22 = vpop.f32.mrb[38].mxu1  ;;  %1819 = vrot.lane.b32.xlu0 %v1818_v31, %s2048_s3 }
 0x50e   :  { %v1010_v15 = vadd.f32 %v1009_v22, %v907_v34  ;;  %v1011_v23 = vpop.f32.mrb[39].mxu1  ;;  %v2480_v16 = vadd.f32 %v1006_v13, %v2292_v46 }
 0x50f   :  { %v1012_v24 = vadd.f32 %v1011_v23, %v907_v34  ;;  %v2486_v18 = vadd.f32 %v1008_v21, %v2301_v48 }
 0x510   :  { %v2483_v25 = vadd.f32 %v1010_v15, %v2295_v40 }
 0x511   :  { %v2489_v27 = vadd.f32 %v1012_v24, %v2304_v41 }
 0x512   :  { %v1131_v28 = vpack.c.bf16 %v2483_v25, %v2480_v16  ;;  %v1823_v29 = vpack.i.bf16 %v2483_v25, %v2480_v16  ;;  %v1869_v16 = vld [vmem:[%s2696_s1 + $0x40] sm:$0xff]   ;;  %v1870_v25 = vld [vmem:[%s2696_s1 + $0x48] sm:$0xff]  }
 0x513   :  { %v2495_v35 = vpop.f32.mrb[8].mxu1  ;;  %v1828_v46 = vpack.i.bf16 %v2489_v27, %v2486_v18  ;;  %v1132_v40 = vpack.c.bf16 %v2489_v27, %v2486_v18 }
 0x514   :  { %v2501_v36 = vpop.f32.mrb[9].mxu1  ;;  %1824 = vrot.lane.b32.xlu1 %v1823_v29, %s2048_s3 }
 0x515   :  { %v2503_v48 = vpop.f32.mrb[10].mxu1  ;;  %1829 = vrot.lane.b32.xlu0 %v1828_v46, %s2048_s3 }
 0x516   :  { %v2505_v41 = vpop.f32.mrb[11].mxu1 }
 0x518   :  { %1834 = vrot.lane.b32.xlu1 %v1813_v17, %s2049_s28 }
 0x519   :  { %1839 = vrot.lane.b32.xlu0 %v1818_v31, %s2049_s28 }
 0x51b   :  { %v2507_v37 = vpop.f32.mrb[12].mxu1 }
 0x51c   :  { %v2509_v39 = vpop.f32.mrb[13].mxu1  ;;  %1844 = vrot.lane.b32.xlu1 %v1823_v29, %s2049_s28 }
 0x51d   :  { %v2511_v43 = vpop.f32.mrb[14].mxu1  ;;  %1849 = vrot.lane.b32.xlu0 %v1828_v46, %s2049_s28 }
 0x51e   :  { %v2516_v4 = vpop.f32.mrb[15].mxu1 }
 0x520   :  { %1168 = vperm.xlu1 %1772, %v1633_v2  }
 0x521   :  { %1173 = vperm.xlu0 %1771, %v1634_v44  }
 0x524   :  { %1178 = vperm.xlu1 %1772, %v1635_v45  }
 0x525   :  { %1183 = vperm.xlu0 %1771, %v1636_v8  }
 0x528   :  { %1148 = vperm.xlu1 %1772, %v1629_v38  }
 0x529   :  { %1153 = vperm.xlu0 %1771, %v1630_v9  }
 0x52c   :  { %1158 = vperm.xlu1 %1772, %v1631_v47  }
 0x52d   :  { %1163 = vperm.xlu0 %1771, %v1632_v49  }
 0x530   :  { %422 = vperm.xlu1 %1772, %v396_v0  }
 0x531   :  { %427 = vperm.xlu0 %1771, %v397_v1  }
 0x534   :  { %432 = vperm.xlu1 %1772, %v398_v5  }
 0x535   :  { %437 = vperm.xlu0 %1771, %v399_v6  }
 0x538   :  { %911 = vperm.xlu1 %1772, %v1609_v42  }
 0x539   :  { %916 = vperm.xlu0 %1771, %v1610_v50  }
 0x53c   :  { %921 = vperm.xlu1 %1772, %v1611_v51  }
 0x53d   :  { %926 = vperm.xlu0 %1771, %v1612_v52  }
 0x540   :  { %1369 = vperm.xlu1 %1772, %v1363_v53  }
 0x541   :  { %1374 = vperm.xlu0 %1771, %v1364_v54  }
 0x544   :  { %1379 = vperm.xlu1 %1772, %v1365_v55  }
 0x545   :  { %1384 = vperm.xlu0 %1771, %v1366_v56  }
 0x57e   :  { %v1815_v57 = vpop.permute.xlu1 %1814 }
 0x57f   :  { %v1817_v58 = vunpack.i.h.bf16 %v1815_v57  ;;  %v1816_v59 = vunpack.i.l.bf16 %v1815_v57  ;;  %v1820_v60 = vpop.permute.xlu0 %1819 }
 0x580   :  { %v1822_v61 = vunpack.i.h.bf16 %v1820_v60  ;;  %v1821_v62 = vunpack.i.l.bf16 %v1820_v60 }
 0x582   :  { %v1067_v63 = vsel %vm1066_vm4, %v1816_v59, %v1821_v62  ;;  %v1068_v17 = vsel %vm1066_vm4, %v1817_v58, %v1822_v61  ;;  %v1071_v19 = vsel %vm1066_vm4, %v1821_v62, %v1816_v59  ;;  %v1072_v20 = vsel %vm1066_vm4, %v1822_v61, %v1817_v58 }
 0x583   :  { %v1642_v13 = vpack.c.bf16 %v1068_v17, %v1067_v63  ;;  %v1645_v33 = vpack.c.bf16 %v1072_v20, %v1071_v19 }
 0x585   :  { %1643 = vmatprep.subr.msk.bf16.mxu0 %vm2586_vm7, %v1642_v13 }
 0x586   :  { %v1825_v21 = vpop.permute.xlu1 %1824  ;;  %1646 = vmatpush1.bf16.msk.msra.mxu0 %vm2590_vm8, %v1645_v33 }
 0x587   :  { %v1827_v22 = vunpack.i.h.bf16 %v1825_v21  ;;  %v1826_v15 = vunpack.i.l.bf16 %v1825_v21  ;;  %v1830_v23 = vpop.permute.xlu0 %1829 }
 0x588   :  { %v1832_v24 = vunpack.i.h.bf16 %v1830_v23  ;;  %v1831_v29 = vunpack.i.l.bf16 %v1830_v23 }
 0x58a   :  { %v1069_v46 = vsel %vm1066_vm4, %v1826_v15, %v1831_v29  ;;  %v1070_v2 = vsel %vm1066_vm4, %v1827_v22, %v1832_v24  ;;  %v1073_v44 = vsel %vm1066_vm4, %v1831_v29, %v1826_v15  ;;  %v1074_v45 = vsel %vm1066_vm4, %v1832_v24, %v1827_v22  ;;  %v1835_v8 = vpop.permute.xlu1 %1834 }
 0x58b   :  { %v1648_v38 = vpack.c.bf16 %v1070_v2, %v1069_v46  ;;  %v1651_v9 = vpack.c.bf16 %v1074_v45, %v1073_v44  ;;  %v1840_v47 = vpop.permute.xlu0 %1839  ;;  %v1837_v49 = vunpack.i.h.bf16 %v1835_v8  ;;  %v1836_v0 = vunpack.i.l.bf16 %v1835_v8 }
 0x58c   :  { %v1842_v1 = vunpack.i.h.bf16 %v1840_v47  ;;  %v1841_v5 = vunpack.i.l.bf16 %v1840_v47 }
 0x58d   :  { %1649 = vmatprep.subr.msk.bf16.mxu0 %vm2586_vm7, %v1648_v38 }
 0x58e   :  { %1652 = vmatpush1.bf16.msk.msra.mxu0 %vm2590_vm8, %v1651_v9  ;;  %v1845_v6 = vpop.permute.xlu1 %1844  ;;  %v1104_v50 = vsel %vm74_vm11, %v1841_v5, %v1836_v0  ;;  %v1105_v51 = vsel %vm74_vm11, %v1842_v1, %v1837_v49  ;;  %v1100_v10 = vsel %vm74_vm11, %v1836_v0, %v1841_v5  ;;  %v1101_v11 = vsel %vm74_vm11, %v1837_v49, %v1842_v1 }
 0x58f   :  { %v1850_v42 = vpop.permute.xlu0 %1849  ;;  %1222 = vmatprep.subr.bf16.mxu0 %v1130_v32  ;;  %v1847_v52 = vunpack.i.h.bf16 %v1845_v6  ;;  %v1846_v53 = vunpack.i.l.bf16 %v1845_v6  ;;  %v1654_v30 = vpack.c.bf16 %v1105_v51, %v1104_v50  ;;  %v1657_v3 = vpack.c.bf16 %v1101_v11, %v1100_v10 }
 0x590   :  { %v1852_v54 = vunpack.i.h.bf16 %v1850_v42  ;;  %v1851_v55 = vunpack.i.l.bf16 %v1850_v42 }
 0x592   :  { %1223 = vmatpush1.bf16.msra.mxu0 %v1129_v14  ;;  %v1106_v32 = vsel %vm74_vm11, %v1851_v55, %v1846_v53  ;;  %v1107_v56 = vsel %vm74_vm11, %v1852_v54, %v1847_v52  ;;  %v1102_v7 = vsel %vm74_vm11, %v1846_v53, %v1851_v55  ;;  %v1103_v14 = vsel %vm74_vm11, %v1847_v52, %v1852_v54 }
 0x593   :  { %1224 = vmatprep.subr.bf16.mxu0 %v1132_v40  ;;  %v1660_v18 = vpack.c.bf16 %v1107_v56, %v1106_v32  ;;  %v1663_v27 = vpack.c.bf16 %v1103_v14, %v1102_v7 }
 0x596   :  { %1225 = vmatpush1.bf16.msra.mxu0 %v1131_v28  ;;  %v1872_v28 = vld [vmem:[%s2696_s1 + $0x58] sm:$0xff]  }
 0x597   :  { %1655 = vmatprep.subr.msk.bf16.mxu0 %vm1653_vm13, %v1654_v30 }
 0x59a   :  { %1658 = vmatpush1.bf16.msk.msra.mxu0 %vm1656_vm14, %v1657_v3 }
 0x59b   :  { %1661 = vmatprep.subr.msk.bf16.mxu0 %vm1653_vm13, %v1660_v18 }
 0x59e   :  { %1664 = vmatpush1.bf16.msk.msra.mxu0 %vm1656_vm14, %v1663_v27 }
 0x59f   :  { %v1169_v61 = vpop.permute.xlu1 %1168 }
 0x5a0   :  { %v1174_v17 = vpop.permute.xlu0 %1173 }
 0x5a1   :  { %1665 = vmatmul.mubr.msk.bf16.vlgmr.msra.gmra.mrb[16].mxu0 %vm230_vm9, %v1869_v16 }
 0x5a2   :  { %1260 = vmatprep.mubr.bf16.mxu0 %v2045_v12 }
 0x5a3   :  { %v1179_v20 = vpop.permute.xlu1 %1178 }
 0x5a4   :  { %v1184_v13 = vpop.permute.xlu0 %1183 }
 0x5a7   :  { %v1149_v2 = vpop.permute.xlu1 %1148 }
 0x5a8   :  { %v1154_v38 = vpop.permute.xlu0 %1153 }
 0x5a9   :  { %1666 = vmatmul.mubr.msk.bf16.gmra.mrb[20].mxu0 %vm230_vm9, %v1870_v25 }
 0x5aa   :  { %1270 = vmatprep.mubr.bf16.mxu0 %v2045_v12 }
 0x5ab   :  { %v1159_v3 = vpop.permute.xlu1 %1158 }
 0x5ac   :  { %v1164_v16 = vpop.permute.xlu0 %1163 }
 0x5b1   :  { %1667 = vmatmul.mubr.msk.bf16.gmra.mrb[24].mxu0 %vm230_vm9, %v1871_v26 }
 0x5b2   :  { %1280 = vmatprep.mubr.bf16.mxu0 %v2045_v12 }
 0x5b9   :  { %1668 = vmatmul.mubr.msk.bf16.gmra.mrb[28].mxu0 %vm230_vm9, %v1872_v28 }
 0x5ba   :  { %1435 = vmatprep.mubr.bf16.mxu0 %v2045_v12 }
 0x674   :  { %v1252_v40 = vpop.f32.mrb[16].mxu0 }
 0x675   :  { %v1254_v57 = vpop.f32.mrb[17].mxu0  ;;  %v1253_v45 = vadd.f32 %v1252_v40, %v1149_v2 }
 0x676   :  { %v1256_v58 = vpop.f32.mrb[18].mxu0  ;;  %v1255_v9 = vadd.f32 %v1254_v57, %v1149_v2 }
 0x677   :  { %v1258_v59 = vpop.f32.mrb[19].mxu0  ;;  %v1257_v47 = vadd.f32 %v1256_v58, %v1154_v38 }
 0x678   :  { %v1259_v54 = vadd.f32 %v1258_v59, %v1154_v38 }
 0x67c   :  { %v1262_v60 = vpop.f32.mrb[20].mxu0 }
 0x67d   :  { %v1264_v62 = vpop.f32.mrb[21].mxu0  ;;  %v1263_v18 = vadd.f32 %v1262_v60, %v1159_v3 }
 0x67e   :  { %v1266_v63 = vpop.f32.mrb[22].mxu0  ;;  %v1265_v25 = vadd.f32 %v1264_v62, %v1159_v3 }
 0x67f   :  { %v2663_v19 = vpop.f32.mrb[23].mxu0  ;;  %v1267_v40 = vadd.f32 %v1266_v63, %v1164_v16 }
 0x680   :  { %v1269_v58 = vadd.f32 %v2663_v19, %v1164_v16 }
 0x684   :  { %v1272_v31 = vpop.f32.mrb[24].mxu0 }
 0x685   :  { %v1273_v33 = vadd.f32 %v1272_v31, %v1169_v61  ;;  %v1274_v34 = vpop.f32.mrb[25].mxu0 }
 0x686   :  { %v1275_v21 = vadd.f32 %v1274_v34, %v1169_v61  ;;  %v1276_v22 = vpop.f32.mrb[26].mxu0 }
 0x687   :  { %v1669_v15 = vmul.f32 -1.442695, %v1273_v33  ;;  %v1277_v23 = vadd.f32 %v1276_v22, %v1174_v17  ;;  %v1278_v24 = vpop.f32.mrb[27].mxu0 }
 0x688   :  { %v1670_v29 = vmul.f32 -1.442695, %v1275_v21  ;;  %v1279_v46 = vadd.f32 %v1278_v24, %v1174_v17 }
 0x689   :  { %1971 = vpow2.f32 %v1669_v15  ;;  %v1671_v44 = vmul.f32 -1.442695, %v1277_v23 }
 0x68a   :  { %1973 = vpow2.f32 %v1670_v29  ;;  %v1672_v8 = vmul.f32 -1.442695, %v1279_v46 }
 0x68b   :  { %1975 = vpow2.f32 %v1671_v44 }
 0x68c   :  { %1977 = vpow2.f32 %v1672_v8  ;;  %v1282_v49 = vpop.f32.mrb[28].mxu0 }
 0x68d   :  { %v1283_v0 = vadd.f32 %v1282_v49, %v1179_v20  ;;  %v1284_v1 = vpop.f32.mrb[29].mxu0  ;;  %1979 = vtanh.f32 %v1253_v45 }
 0x68e   :  { %v1285_v5 = vadd.f32 %v1284_v1, %v1179_v20  ;;  %v1286_v6 = vpop.f32.mrb[30].mxu0  ;;  %1981 = vtanh.f32 %v1255_v9 }
 0x68f   :  { %v1673_v42 = vmul.f32 -1.442695, %v1283_v0  ;;  %v1287_v50 = vadd.f32 %v1286_v6, %v1184_v13  ;;  %v1288_v51 = vpop.f32.mrb[31].mxu0  ;;  %1983 = vtanh.f32 %v1257_v47 }
 0x690   :  { %v1674_v52 = vmul.f32 -1.442695, %v1285_v5  ;;  %v1289_v53 = vadd.f32 %v1288_v51, %v1184_v13 }
 0x691   :  { %1985 = vpow2.f32 %v1673_v42  ;;  %v1675_v55 = vmul.f32 -1.442695, %v1287_v50 }
 0x692   :  { %1987 = vpow2.f32 %v1674_v52  ;;  %v1676_v10 = vmul.f32 -1.442695, %v1289_v53  ;;  %v1873_v52 = vld [vmem:[%s2700_s5] sm:$0xff]   ;;  %v1874_v53 = vld [vmem:[%s2700_s5 + $0x8] sm:$0xff]   ;;  %s2050_s5 = smov [#allocation2]  }
 0x693   :  { %v1972_v11 = vpop.eup %1971  ;;  %1989 = vpow2.f32 %v1675_v55  ;;  %v428_v55 = vpop.permute.xlu0 %427  ;;  %s1478_s3 = sshll.u32 %s2050_s5, 4  ;;  %s1479_s3 = int_to_ptr.vmem [resolvable:$true] %s1478_s3 }
 0x694   :  { %v1974_v30 = vpop.eup %1973  ;;  %v1323_v32 = vadd.f32 1.0, %v1972_v11  ;;  %1991 = vpow2.f32 %v1676_v10  ;;  %s2019_s2 = scalar_lea.vmem %s1479_s3, 1024  ;;  %p2024_p1 = scmp.lt.s32.totalorder %s1479_s3, %s1479_s3 }
 0x695   :  { %v1976_v56 = vpop.eup %1975  ;;  %1993 = vtanh.f32 %v1259_v54  ;;  %v1324_v7 = vadd.f32 1.0, %v1974_v30  ;;  %v423_v54 = vpop.permute.xlu1 %422  ;;  %p2020_p0 = scmp.ne.s32.totalorder %s1479_s3, %s2019_s2  ;;  %p2025_p2 = scmp.lt.s32.totalorder %s2019_s2, %s2019_s2 }
 0x696   :  { %v1978_v14 = vpop.eup %1977  ;;  %1995 = vrcp.f32 %v1323_v32  ;;  %v1325_v27 = vadd.f32 1.0, %v1976_v56 }
 0x697   :  { %1997 = vrcp.f32 %v1324_v7  ;;  %v1326_v26 = vadd.f32 1.0, %v1978_v14  ;;  %v1980_v28 = vpop.eup %1979  ;;  %v438_v11 = vpop.permute.xlu0 %437  ;;  %p2026_p3 = por %p2025_p2, %p2024_p1 }
 0x698   :  { %1999 = vrcp.f32 %v1325_v27  ;;  %v1982_v57 = vpop.eup %1981 }
 0x699   :  { %2001 = vrcp.f32 %v1326_v26  ;;  %v1984_v59 = vpop.eup %1983  ;;  %v433_v10 = vpop.permute.xlu1 %432  ;;  %p2027_p4 = pnand %p2026_p3, %p2020_p0 }
 0x69a   :  { %2003 = vtanh.f32 %v1263_v18 }
 0x69b   :  { %v1986_v61 = vpop.eup %1985  ;;  %2005 = vtanh.f32 %v1265_v25  ;;  %v917_v32 = vpop.permute.xlu0 %916 }
 0x69c   :  { %v1988_v17 = vpop.eup %1987  ;;  %2007 = vtanh.f32 %v1267_v40  ;;  %v1327_v60 = vadd.f32 1.0, %v1986_v61  ;;  %v1689_v14 = vadd.f32 %v917_v32, %v428_v55 }
 0x69d   :  { %v1990_v20 = vpop.eup %1989  ;;  %2009 = vtanh.f32 %v1269_v58  ;;  %v1328_v31 = vadd.f32 1.0, %v1988_v17  ;;  %v912_v30 = vpop.permute.xlu1 %911 }
 0x69e   :  { %v1992_v62 = vpop.eup %1991  ;;  %2011 = vrcp.f32 %v1327_v60  ;;  %v1329_v13 = vadd.f32 1.0, %v1990_v20  ;;  %v1681_v7 = vadd.f32 %v912_v30, %v423_v54  ;;  %v1690_v25 = vadd.f32 %v1689_v14, %v2503_v48 }
 0x69f   :  { %v1994_v33 = vpop.eup %1993  ;;  %2013 = vrcp.f32 %v1328_v31  ;;  %v1330_v63 = vadd.f32 1.0, %v1992_v62  ;;  %v927_v3 = vpop.permute.xlu0 %926 }
 0x6a0   :  { %v1996_v34 = vpop.eup %1995  ;;  %2015 = vrcp.f32 %v1329_v13  ;;  %v1682_v27 = vadd.f32 %v1681_v7, %v2495_v35  ;;  %v1705_v62 = vadd.f32 %v927_v3, %v438_v11 }
 0x6a1   :  { %v1998_v19 = vpop.eup %1997  ;;  %2017 = vrcp.f32 %v1330_v63  ;;  %v1347_v21 = vmul.f32 %v1996_v34, %v1980_v28  ;;  %v922_v56 = vpop.permute.xlu1 %921  ;;  %v1694_v28 = vadd.f32 %v1689_v14, %v2505_v41 }
 0x6a2   :  { %v2000_v22 = vpop.eup %1999  ;;  %v1348_v15 = vmul.f32 %v1998_v19, %v1982_v57  ;;  %v1697_v58 = vadd.f32 %v922_v56, %v433_v10  ;;  %v1706_v19 = vadd.f32 %v1705_v62, %v2511_v43 }
 0x6a3   :  { %v2002_v23 = vpop.eup %2001  ;;  %v1349_v24 = vmul.f32 %v2000_v22, %v1984_v59  ;;  %v1375_v16 = vpop.permute.xlu0 %1374  ;;  %v1710_v22 = vadd.f32 %v1705_v62, %v2516_v4 }
 0x6a4   :  { %v2004_v29 = vpop.eup %2003  ;;  %v1350_v46 = vmul.f32 %v2002_v23, %v1994_v33  ;;  %v1691_v59 = vadd.f32 %v1690_v25, %v1375_v16  ;;  %v1695_v60 = vadd.f32 %v1694_v28, %v1375_v16  ;;  %v1698_v48 = vadd.f32 %v1697_v58, %v2507_v37 }
 0x6a5   :  { %v2006_v2 = vpop.eup %2005  ;;  %v1355_v44 = vpack.c.bf16 %v1349_v24, %v1347_v21  ;;  %v1370_v18 = vpop.permute.xlu1 %1369  ;;  %v1702_v41 = vadd.f32 %v1697_v58, %v2509_v39 }
 0x6a6   :  { %v2008_v45 = vpop.eup %2007  ;;  %v1356_v8 = vpack.c.bf16 %v1350_v46, %v1348_v15  ;;  %v1683_v26 = vadd.f32 %v1682_v27, %v1370_v18 }
 0x6a7   :  { %v2010_v38 = vpop.eup %2009  ;;  %v1385_v63 = vpop.permute.xlu0 %1384 }
 0x6a8   :  { %v2012_v9 = vpop.eup %2011  ;;  %1403 = vmatprep.subr.bf16.mxu0 %v1356_v8  ;;  %v1707_v23 = vadd.f32 %v1706_v19, %v1385_v63  ;;  %v1711_v46 = vadd.f32 %v1710_v22, %v1385_v63 }
 0x6a9   :  { %v2014_v47 = vpop.eup %2013  ;;  %1404 = vmatpush1.bf16.msra.mxu0 %v1355_v44  ;;  %v1351_v49 = vmul.f32 %v2012_v9, %v2004_v29 }
 0x6aa   :  { %v2016_v0 = vpop.eup %2015  ;;  %v1352_v1 = vmul.f32 %v2014_v47, %v2006_v2 }
 0x6ab   :  { %v2018_v5 = vpop.eup %2017  ;;  %v1353_v6 = vmul.f32 %v2016_v0, %v2008_v45 }
 0x6ac   :  { %v1354_v42 = vmul.f32 %v2018_v5, %v2010_v38 }
 0x6ad   :  { %v1357_v50 = vpack.c.bf16 %v1353_v6, %v1351_v49 }
 0x6ae   :  { %v1358_v51 = vpack.c.bf16 %v1354_v42, %v1352_v1 }
 0x6b0   :  { %1405 = vmatprep.subr.bf16.mxu0 %v1358_v51 }
 0x6b1   :  { %1406 = vmatpush1.bf16.msra.mxu0 %v1357_v50 }
 0x6b4   :  { %1679 = vmatmul.mubr.msk.bf16.vlgmr.msra.gmra.mrb[32].mxu0 %vm460_vm10, %v1873_v52 }
 0x6b5   :  { %1445 = vmatprep.mubr.bf16.mxu0 %v2045_v12  ;;  %v1686_v12 = vadd.f32 %v1681_v7, %v2501_v36  ;;  %v1380_v36 = vpop.permute.xlu1 %1379 }
 0x6b6   :  { %v1699_v34 = vadd.f32 %v1698_v48, %v1380_v36  ;;  %v1703_v21 = vadd.f32 %v1702_v41, %v1380_v36 }
 0x6b7   :  { %v1687_v40 = vadd.f32 %v1686_v12, %v1370_v18 }
 0x6bc   :  { %1680 = vmatmul.mubr.msk.bf16.gmra.mrb[36].mxu0 %vm460_vm10, %v1874_v53 }
 0x787   :  { %v1437_v57 = vpop.f32.mrb[32].mxu0 }
 0x788   :  { %v1684_v61 = vadd.f32 %v1683_v26, %v1437_v57  ;;  %v1439_v17 = vpop.f32.mrb[33].mxu0 }
 0x789   :  { %v1688_v20 = vadd.f32 %v1687_v40, %v1439_v17  ;;  %v1441_v31 = vpop.f32.mrb[34].mxu0 }
 0x78a   :  { %1464 = vst [vmem:[#allocation2] sm:$0xff] %v1684_v61  ;;  %v1692_v35 = vadd.f32 %v1691_v59, %v1441_v31  ;;  %v1443_v13 = vpop.f32.mrb[35].mxu0 }
 0x78b   :  { %1469 = vst [vmem:[#allocation2 + $0x20] sm:$0xff] %v1688_v20  ;;  %v1696_v33 = vadd.f32 %v1695_v60, %v1443_v13 }
 0x78c   :  { %1465 = vst [vmem:[#allocation2 + $0x8] sm:$0xff] %v1692_v35 }
 0x78d   :  { %1470 = vst [vmem:[#allocation2 + $0x28] sm:$0xff] %v1696_v33 }
 0x78f   :  { %v1447_v15 = vpop.f32.mrb[36].mxu0 }
 0x790   :  { %v1700_v24 = vadd.f32 %v1699_v34, %v1447_v15  ;;  %v1449_v29 = vpop.f32.mrb[37].mxu0 }
 0x791   :  { %v1704_v2 = vadd.f32 %v1703_v21, %v1449_v29  ;;  %v1451_v37 = vpop.f32.mrb[38].mxu0 }
 0x792   :  { %1466 = vst [vmem:[#allocation2 + $0x10] sm:$0xff] %v1700_v24  ;;  %v1708_v44 = vadd.f32 %v1707_v23, %v1451_v37  ;;  %v1453_v39 = vpop.f32.mrb[39].mxu0 }
 0x793   :  { %1471 = vst [vmem:[#allocation2 + $0x30] sm:$0xff] %v1704_v2  ;;  %v1712_v45 = vadd.f32 %v1711_v46, %v1453_v39 }
 0x794   :  { %1467 = vst [vmem:[#allocation2 + $0x18] sm:$0xff] %v1708_v44 }
 0x795   :  { %1472 = vst [vmem:[#allocation2 + $0x38] sm:$0xff] %v1712_v45 }
 0x796   :  { %2030 = shalt.err (!%p2027_p4)
}
 0x797   :  { %s2031_s30 = scalar_lea.hbm %s2702_s7, 1024 }
 0x798   :  { %p2032_p5 = scmp.ne.s32.totalorder %s2702_s7, %s2031_s30  ;;  %p2035_p6 = scmp.lt.u32.totalorder %s2031_s30, %s2702_s7 }
 0x79a   :  { %p2037_p7 = pnand %p2035_p6, %p2032_p5 }
 0x79c   :  { %2040 = shalt.err (!%p2037_p7)
}
 0x79d   :  { %s2051_s12 = smov 128   ;;  %s2052_s13 = smov 8  }
 0x79e   :  { %1484 = dma.vmem_to_hbm [thread:$0]  %s1479_s3, 1024, %s2702_s7, [#allocation3], %s2051_s12, %s2051_s12, %s2052_s13  }
 0x79f   :  { %2041 = dma.done.wait [#allocation3], 1024  }
 0x7a0   :  { %2042 = vsyncadd [#allocation3], 4294966272 }
 0x7a1   :  { %1488 = vsyncpa [#allocation3], 1 }

</bundles_post_ra>
